<compile_context>
chip_gen: v5e
topology: v5e:2x2
jax: 0.10.0
libtpu: 0.0.40
codegen_flags: <defaults>
</compile_context>

<pallas_src>
from functools import partial

import jax
import jax.numpy as jnp
from jax.experimental import pallas as pl
from jax.experimental.pallas import tpu as pltpu

# ---------------- hyperparameters (synthetic, deterministic) ----------------
NSP = 10          # number of speakers (fixed by the module: assert Nsp == 10)
N_ENC = 128       # encoder feature dim
H_MASK = 128      # masknet hidden dim
K_ENC = 16        # encoder / decoder kernel size
S_ENC = 8         # encoder / decoder stride
P_RES = 16        # resampler filter half-width
K_RES = 2 * P_RES + 1
S_RES = 2         # 16 kHz -> 8 kHz decimation factor

# Row tile for the fused kernel.  1024 is safe for v7x's 64 MiB VMEM; v5e/v6e
# (128 MiB) could use 2048-4096 — sweep per generation if needed.
TM_MAX = 1024


def _round_up(n, m):
    return ((n + m - 1) // m) * m


# ------------------------------ Pallas kernels ------------------------------
def _resample_kernel(filt_ref, xe_ref, xo_ref, out_ref):
    # Polyphase decimate-by-2:
    #   out[b, t] = sum_k filt[k] * xp[b, 2t + k]
    # with xe[b, i] = xp[b, 2i], xo[b, i] = xp[b, 2i + 1].
    # Pure VPU FMAs on lane-dense (B, T8) data; taps read as SMEM scalars.
    t8 = out_ref.shape[1]
    acc = filt_ref[0] * xe_ref[:, 0:t8]
    for k in range(1, K_RES):                  # static unrolled tap loop (33 taps)
        j = k // 2
        src = xe_ref[:, j:j + t8] if (k % 2 == 0) else xo_ref[:, j:j + t8]
        acc = acc + filt_ref[k] * src
    out_ref[...] = acc


def _sepformer_kernel(x_ref, wenc_ref, benc_ref, w1_ref, b1_ref, w2_ref, b2_ref,
                      wdec_ref, dec_ref, feat_ref):
    # x: (TM, K_ENC) encoder input frames for one row tile.
    # All matmul inputs are cast to bf16 (weights pre-cast outside); accumulation
    # in f32 via preferred_element_type.  Bias/ReLU/mask multiply stay f32.
    tm = x_ref.shape[0]
    bf16 = jnp.bfloat16
    x = x_ref[...]

    # encoder: Conv1d(1, N_ENC, K_ENC, stride=S_ENC) + ReLU (as frame matmul)
    feat = jnp.dot(x.astype(bf16), wenc_ref[...],
                   preferred_element_type=jnp.float32) + benc_ref[...]
    feat = jnp.maximum(feat, 0.0)                                   # (TM, N_ENC)

    # mask estimator (stand-in for the dual-path transformer masknet)
    h = jnp.dot(feat.astype(bf16), w1_ref[...],
                preferred_element_type=jnp.float32) + b1_ref[...]
    h = jnp.maximum(h, 0.0)
    m = jnp.dot(h.astype(bf16), w2_ref[...],
                preferred_element_type=jnp.float32) + b2_ref[...]
    m = jnp.maximum(m, 0.0)                                         # (TM, NSP*N_ENC)

    # apply masks + decoder: stack speakers along rows (slices are 128-lane
    # aligned -> whole-vreg moves), run ONE MXU matmul for all 10 decoders,
    # then assemble and write a single lane-dense 160-wide store.
    masked = jnp.concatenate(
        [feat * m[:, s * N_ENC:(s + 1) * N_ENC] for s in range(NSP)], axis=0)
    dec_rows = jnp.dot(masked.astype(bf16), wdec_ref[...],
                       preferred_element_type=jnp.float32)          # (NSP*TM, K_ENC)
    dec_ref[...] = jnp.concatenate(
        [dec_rows[s * tm:(s + 1) * tm, :] for s in range(NSP)], axis=-1)
    feat_ref[...] = feat


# ------------------------------- JAX wrappers --------------------------------
def resample_16k_to_8k(x16, filt):
    B, L16 = x16.shape
    T8 = -(-L16 // S_RES)                      # ceil(L16 / 2), torchaudio output length
    xp = jnp.pad(x16, ((0, 0), (P_RES, P_RES + S_RES)))
    if xp.shape[1] % 2:
        xp = jnp.pad(xp, ((0, 0), (0, 1)))
    xph = xp.reshape(B, -1, 2)
    xe = xph[:, :, 0]                          # xp[2i]
    xo = xph[:, :, 1]                          # xp[2i+1]
    return pl.pallas_call(
        _resample_kernel,
        out_shape=jax.ShapeDtypeStruct((B, T8), jnp.float32),
        in_specs=[pl.BlockSpec(memory_space=pltpu.MemorySpace.SMEM),
                  pl.BlockSpec(memory_space=pltpu.MemorySpace.VMEM),
                  pl.BlockSpec(memory_space=pltpu.MemorySpace.VMEM)],
        out_specs=pl.BlockSpec(memory_space=pltpu.MemorySpace.VMEM),
    )(filt, xe, xo)


def sepformer_forward(mixture_at_16khz, params):
    B, _ = mixture_at_16khz.shape

    # 1) resample 16k -> 8k
    x8 = resample_16k_to_8k(mixture_at_16khz, params["resample_filter"])   # (B, L8)
    L8 = x8.shape[1]

    # 2) encoder im2col via two shifted stride-8 slabs (no gather, ~2x read)
    n_blk = L8 // S_ENC
    T = n_blk - 1                              # == (L8 - K_ENC)//S_ENC + 1
    blocks = x8[:, :n_blk * S_ENC].reshape(B, n_blk, S_ENC)
    frames = jnp.concatenate([blocks[:, :T, :], blocks[:, 1:, :]], axis=-1)
    frames = frames.reshape(B * T, K_ENC)

    # row tiling over B*T (parallel grid, weights VMEM-resident)
    R = B * T
    TM = min(TM_MAX, _round_up(R, 8))
    R_pad = _round_up(R, TM)
    if R_pad != R:
        frames = jnp.pad(frames, ((0, R_pad - R), (0, 0)))
    grid = (R_pad // TM,)

    bf16 = jnp.bfloat16
    w_enc = params["w_enc"].astype(bf16)
    w1 = params["w1"].astype(bf16)
    w2 = params["w2"].astype(bf16)
    w_dec = params["w_dec"].astype(bf16)
    b_enc, b1, b2 = params["b_enc"], params["b1"], params["b2"]

    in_specs = [
        pl.BlockSpec((TM, K_ENC), lambda i: (i, 0)),          # frames: row tiles
        pl.BlockSpec(w_enc.shape, lambda i: (0, 0)),          # weights: resident
        pl.BlockSpec(b_enc.shape, lambda i: (0, 0)),
        pl.BlockSpec(w1.shape, lambda i: (0, 0)),
        pl.BlockSpec(b1.shape, lambda i: (0, 0)),
        pl.BlockSpec(w2.shape, lambda i: (0, 0)),
        pl.BlockSpec(b2.shape, lambda i: (0, 0)),
        pl.BlockSpec(w_dec.shape, lambda i: (0, 0)),
    ]
    out_specs = (pl.BlockSpec((TM, NSP * K_ENC), lambda i: (i, 0)),
                 pl.BlockSpec((TM, N_ENC), lambda i: (i, 0)))

    mm_flops_per_row = (K_ENC * N_ENC + N_ENC * H_MASK
                        + H_MASK * NSP * N_ENC + NSP * N_ENC * K_ENC)
    flops = 2 * R_pad * mm_flops_per_row
    bytes_accessed = (4 * R_pad * (K_ENC + NSP * K_ENC + N_ENC)
                      + 2 * (K_ENC * N_ENC + N_ENC * H_MASK
                             + H_MASK * NSP * N_ENC + N_ENC * K_ENC)
                      + 4 * (N_ENC + H_MASK + NSP * N_ENC))

    dec_flat, feat_flat = pl.pallas_call(
        _sepformer_kernel,
        out_shape=(jax.ShapeDtypeStruct((R_pad, NSP * K_ENC), jnp.float32),
                   jax.ShapeDtypeStruct((R_pad, N_ENC), jnp.float32)),
        grid=grid,
        in_specs=in_specs,
        out_specs=out_specs,
        compiler_params=pltpu.CompilerParams(
            dimension_semantics=("parallel",),
            vmem_limit_bytes=48 * 1024 * 1024),
        cost_estimate=pl.CostEstimate(flops=flops, transcendentals=0,
                                      bytes_accessed=bytes_accessed),
    )(frames, w_enc, b_enc, w1, b1, w2, b2, w_dec)
    dec_flat = dec_flat[:R]
    feat_flat = feat_flat[:R]

    # 3) decoder overlap-add (ConvTranspose1d, stride S_ENC).  K_ENC == 2*S_ENC,
    # so each output sample is the sum of exactly two shifted frame halves:
    # two reshapes + pads + one add instead of a serialized scatter.
    dec_frames = dec_flat.reshape(B, T, NSP, K_ENC).transpose(0, 2, 1, 3)   # (B,NSP,T,K)
    first = dec_frames[..., :S_ENC].reshape(B, NSP, T * S_ENC)
    second = dec_frames[..., S_ENC:].reshape(B, NSP, T * S_ENC)
    est = (jnp.pad(first, ((0, 0), (0, 0), (0, S_ENC)))
           + jnp.pad(second, ((0, 0), (0, 0), (S_ENC, 0))))                 # (B,NSP,L_dec)
    L_dec = T * S_ENC + S_ENC

    # pad / trim to the 8 kHz mixture length (SepFormer output alignment)
    if L_dec >= L8:
        predicted = est[:, :, :L8]
    else:
        predicted = jnp.pad(est, ((0, 0), (0, 0), (0, L8 - L_dec)))

    # (module returns est_sources.permute(0,2,1); est is already (B, NSP, L8),
    # so the cancelling double transpose of the previous version is removed.)
    assert predicted.shape == (B, NSP, L8) and NSP == 10

    features = feat_flat.reshape(B, T, N_ENC).transpose(0, 2, 1)            # (B, N_ENC, T)
    return predicted, features


def make_params(key):
    k = jax.random.split(key, 7)
    # Hann-windowed sinc anti-alias lowpass for decimation by 2 (rolloff 0.99)
    n = jnp.arange(K_RES, dtype=jnp.float32) - P_RES
    fc = 0.99 * 0.5
    window = 0.5 * (1.0 + jnp.cos(jnp.pi * n / (P_RES + 1)))
    filt = (fc * jnp.sinc(fc * n) * window).astype(jnp.float32)
    return {
        "resample_filter": filt,
        "w_enc": 0.1 * jax.random.normal(k[0], (K_ENC, N_ENC), jnp.float32),
        "b_enc": 0.01 * jax.random.normal(k[1], (1, N_ENC), jnp.float32),
        "w1":    0.1 * jax.random.normal(k[2], (N_ENC, H_MASK), jnp.float32),
        "b1":    0.01 * jax.random.normal(k[3], (1, H_MASK), jnp.float32),
        "w2":    0.1 * jax.random.normal(k[4], (H_MASK, NSP * N_ENC), jnp.float32),
        "b2":    0.01 * jax.random.normal(k[5], (1, NSP * N_ENC), jnp.float32),
        "w_dec": 0.1 * jax.random.normal(k[6], (N_ENC, K_ENC), jnp.float32),
    }


if __name__ == "__main__":
    key = jax.random.PRNGKey(0)
    pkey, xkey = jax.random.split(key)
    params = make_params(pkey)

    B, L16 = 2, 512                                   # small 16 kHz mixture
    mixture_at_16khz = jax.random.normal(xkey, (B, L16), jnp.float32)

    fwd = jax.jit(partial(sepformer_forward, params=params))
    predicted, features = fwd(mixture_at_16khz)
    jax.block_until_ready((predicted, features))

    L8 = L16 // 2
    T = (L8 - K_ENC) // S_ENC + 1
    assert predicted.shape == (B, NSP, L8)
    assert features.shape == (B, N_ENC, T)
    print("KERNEL_OK")
</pallas_src>

<mosaic_0001>
module attributes {stable_mosaic.version = 11 : i64} {
  func.func @_resample_kernel(%arg0: memref<33xf32, #tpu.memory_space<smem>>, %arg1: memref<2x273xf32, #tpu.memory_space<vmem>>, %arg2: memref<2x273xf32, #tpu.memory_space<vmem>>, %arg3: memref<2x256xf32, #tpu.memory_space<vmem>>) attributes {dimension_semantics = [], scalar_prefetch = 0 : i64, scratch_operands = 0 : i64, tpu.core_type = #tpu.core_type<tc>} {
    %c0 = arith.constant 0 : index
    %0 = memref.load %arg0[%c0] : memref<33xf32, #tpu.memory_space<smem>>
    %c0_0 = arith.constant 0 : index
    %c0_1 = arith.constant 0 : index
    %1 = vector.load %arg1[%c0_0, %c0_1] : memref<2x273xf32, #tpu.memory_space<vmem>>, vector<2x256xf32>
    %2 = vector.broadcast %0 : f32 to vector<2x256xf32>
    %3 = arith.mulf %2, %1 : vector<2x256xf32>
    %c0_2 = arith.constant 0 : index
    %c0_3 = arith.constant 0 : index
    %4 = vector.load %arg2[%c0_2, %c0_3] : memref<2x273xf32, #tpu.memory_space<vmem>>, vector<2x256xf32>
    %c1 = arith.constant 1 : index
    %5 = memref.load %arg0[%c1] : memref<33xf32, #tpu.memory_space<smem>>
    %6 = vector.broadcast %5 : f32 to vector<2x256xf32>
    %7 = arith.mulf %6, %4 : vector<2x256xf32>
    %8 = arith.addf %3, %7 : vector<2x256xf32>
    %c0_4 = arith.constant 0 : index
    %c1_5 = arith.constant 1 : index
    %9 = vector.load %arg1[%c0_4, %c1_5] : memref<2x273xf32, #tpu.memory_space<vmem>>, vector<2x256xf32>
    %c2 = arith.constant 2 : index
    %10 = memref.load %arg0[%c2] : memref<33xf32, #tpu.memory_space<smem>>
    %11 = vector.broadcast %10 : f32 to vector<2x256xf32>
    %12 = arith.mulf %11, %9 : vector<2x256xf32>
    %13 = arith.addf %8, %12 : vector<2x256xf32>
    %c0_6 = arith.constant 0 : index
    %c1_7 = arith.constant 1 : index
    %14 = vector.load %arg2[%c0_6, %c1_7] : memref<2x273xf32, #tpu.memory_space<vmem>>, vector<2x256xf32>
    %c3 = arith.constant 3 : index
    %15 = memref.load %arg0[%c3] : memref<33xf32, #tpu.memory_space<smem>>
    %16 = vector.broadcast %15 : f32 to vector<2x256xf32>
    %17 = arith.mulf %16, %14 : vector<2x256xf32>
    %18 = arith.addf %13, %17 : vector<2x256xf32>
    %c0_8 = arith.constant 0 : index
    %c2_9 = arith.constant 2 : index
    %19 = vector.load %arg1[%c0_8, %c2_9] : memref<2x273xf32, #tpu.memory_space<vmem>>, vector<2x256xf32>
    %c4 = arith.constant 4 : index
    %20 = memref.load %arg0[%c4] : memref<33xf32, #tpu.memory_space<smem>>
    %21 = vector.broadcast %20 : f32 to vector<2x256xf32>
    %22 = arith.mulf %21, %19 : vector<2x256xf32>
    %23 = arith.addf %18, %22 : vector<2x256xf32>
    %c0_10 = arith.constant 0 : index
    %c2_11 = arith.constant 2 : index
    %24 = vector.load %arg2[%c0_10, %c2_11] : memref<2x273xf32, #tpu.memory_space<vmem>>, vector<2x256xf32>
    %c5 = arith.constant 5 : index
    %25 = memref.load %arg0[%c5] : memref<33xf32, #tpu.memory_space<smem>>
    %26 = vector.broadcast %25 : f32 to vector<2x256xf32>
    %27 = arith.mulf %26, %24 : vector<2x256xf32>
    %28 = arith.addf %23, %27 : vector<2x256xf32>
    %c0_12 = arith.constant 0 : index
    %c3_13 = arith.constant 3 : index
    %29 = vector.load %arg1[%c0_12, %c3_13] : memref<2x273xf32, #tpu.memory_space<vmem>>, vector<2x256xf32>
    %c6 = arith.constant 6 : index
    %30 = memref.load %arg0[%c6] : memref<33xf32, #tpu.memory_space<smem>>
    %31 = vector.broadcast %30 : f32 to vector<2x256xf32>
    %32 = arith.mulf %31, %29 : vector<2x256xf32>
    %33 = arith.addf %28, %32 : vector<2x256xf32>
    %c0_14 = arith.constant 0 : index
    %c3_15 = arith.constant 3 : index
    %34 = vector.load %arg2[%c0_14, %c3_15] : memref<2x273xf32, #tpu.memory_space<vmem>>, vector<2x256xf32>
    %c7 = arith.constant 7 : index
    %35 = memref.load %arg0[%c7] : memref<33xf32, #tpu.memory_space<smem>>
    %36 = vector.broadcast %35 : f32 to vector<2x256xf32>
    %37 = arith.mulf %36, %34 : vector<2x256xf32>
    %38 = arith.addf %33, %37 : vector<2x256xf32>
    %c0_16 = arith.constant 0 : index
    %c4_17 = arith.constant 4 : index
    %39 = vector.load %arg1[%c0_16, %c4_17] : memref<2x273xf32, #tpu.memory_space<vmem>>, vector<2x256xf32>
    %c8 = arith.constant 8 : index
    %40 = memref.load %arg0[%c8] : memref<33xf32, #tpu.memory_space<smem>>
    %41 = vector.broadcast %40 : f32 to vector<2x256xf32>
    %42 = arith.mulf %41, %39 : vector<2x256xf32>
    %43 = arith.addf %38, %42 : vector<2x256xf32>
    %c0_18 = arith.constant 0 : index
    %c4_19 = arith.constant 4 : index
    %44 = vector.load %arg2[%c0_18, %c4_19] : memref<2x273xf32, #tpu.memory_space<vmem>>, vector<2x256xf32>
    %c9 = arith.constant 9 : index
    %45 = memref.load %arg0[%c9] : memref<33xf32, #tpu.memory_space<smem>>
    %46 = vector.broadcast %45 : f32 to vector<2x256xf32>
    %47 = arith.mulf %46, %44 : vector<2x256xf32>
    %48 = arith.addf %43, %47 : vector<2x256xf32>
    %c0_20 = arith.constant 0 : index
    %c5_21 = arith.constant 5 : index
    %49 = vector.load %arg1[%c0_20, %c5_21] : memref<2x273xf32, #tpu.memory_space<vmem>>, vector<2x256xf32>
    %c10 = arith.constant 10 : index
    %50 = memref.load %arg0[%c10] : memref<33xf32, #tpu.memory_space<smem>>
    %51 = vector.broadcast %50 : f32 to vector<2x256xf32>
    %52 = arith.mulf %51, %49 : vector<2x256xf32>
    %53 = arith.addf %48, %52 : vector<2x256xf32>
    %c0_22 = arith.constant 0 : index
    %c5_23 = arith.constant 5 : index
    %54 = vector.load %arg2[%c0_22, %c5_23] : memref<2x273xf32, #tpu.memory_space<vmem>>, vector<2x256xf32>
    %c11 = arith.constant 11 : index
    %55 = memref.load %arg0[%c11] : memref<33xf32, #tpu.memory_space<smem>>
    %56 = vector.broadcast %55 : f32 to vector<2x256xf32>
    %57 = arith.mulf %56, %54 : vector<2x256xf32>
    %58 = arith.addf %53, %57 : vector<2x256xf32>
    %c0_24 = arith.constant 0 : index
    %c6_25 = arith.constant 6 : index
    %59 = vector.load %arg1[%c0_24, %c6_25] : memref<2x273xf32, #tpu.memory_space<vmem>>, vector<2x256xf32>
    %c12 = arith.constant 12 : index
    %60 = memref.load %arg0[%c12] : memref<33xf32, #tpu.memory_space<smem>>
    %61 = vector.broadcast %60 : f32 to vector<2x256xf32>
    %62 = arith.mulf %61, %59 : vector<2x256xf32>
    %63 = arith.addf %58, %62 : vector<2x256xf32>
    %c0_26 = arith.constant 0 : index
    %c6_27 = arith.constant 6 : index
    %64 = vector.load %arg2[%c0_26, %c6_27] : memref<2x273xf32, #tpu.memory_space<vmem>>, vector<2x256xf32>
    %c13 = arith.constant 13 : index
    %65 = memref.load %arg0[%c13] : memref<33xf32, #tpu.memory_space<smem>>
    %66 = vector.broadcast %65 : f32 to vector<2x256xf32>
    %67 = arith.mulf %66, %64 : vector<2x256xf32>
    %68 = arith.addf %63, %67 : vector<2x256xf32>
    %c0_28 = arith.constant 0 : index
    %c7_29 = arith.constant 7 : index
    %69 = vector.load %arg1[%c0_28, %c7_29] : memref<2x273xf32, #tpu.memory_space<vmem>>, vector<2x256xf32>
    %c14 = arith.constant 14 : index
    %70 = memref.load %arg0[%c14] : memref<33xf32, #tpu.memory_space<smem>>
    %71 = vector.broadcast %70 : f32 to vector<2x256xf32>
    %72 = arith.mulf %71, %69 : vector<2x256xf32>
    %73 = arith.addf %68, %72 : vector<2x256xf32>
    %c0_30 = arith.constant 0 : index
    %c7_31 = arith.constant 7 : index
    %74 = vector.load %arg2[%c0_30, %c7_31] : memref<2x273xf32, #tpu.memory_space<vmem>>, vector<2x256xf32>
    %c15 = arith.constant 15 : index
    %75 = memref.load %arg0[%c15] : memref<33xf32, #tpu.memory_space<smem>>
    %76 = vector.broadcast %75 : f32 to vector<2x256xf32>
    %77 = arith.mulf %76, %74 : vector<2x256xf32>
    %78 = arith.addf %73, %77 : vector<2x256xf32>
    %c0_32 = arith.constant 0 : index
    %c8_33 = arith.constant 8 : index
    %79 = vector.load %arg1[%c0_32, %c8_33] : memref<2x273xf32, #tpu.memory_space<vmem>>, vector<2x256xf32>
    %c16 = arith.constant 16 : index
    %80 = memref.load %arg0[%c16] : memref<33xf32, #tpu.memory_space<smem>>
    %81 = vector.broadcast %80 : f32 to vector<2x256xf32>
    %82 = arith.mulf %81, %79 : vector<2x256xf32>
    %83 = arith.addf %78, %82 : vector<2x256xf32>
    %c0_34 = arith.constant 0 : index
    %c8_35 = arith.constant 8 : index
    %84 = vector.load %arg2[%c0_34, %c8_35] : memref<2x273xf32, #tpu.memory_space<vmem>>, vector<2x256xf32>
    %c17 = arith.constant 17 : index
    %85 = memref.load %arg0[%c17] : memref<33xf32, #tpu.memory_space<smem>>
    %86 = vector.broadcast %85 : f32 to vector<2x256xf32>
    %87 = arith.mulf %86, %84 : vector<2x256xf32>
    %88 = arith.addf %83, %87 : vector<2x256xf32>
    %c0_36 = arith.constant 0 : index
    %c9_37 = arith.constant 9 : index
    %89 = vector.load %arg1[%c0_36, %c9_37] : memref<2x273xf32, #tpu.memory_space<vmem>>, vector<2x256xf32>
    %c18 = arith.constant 18 : index
    %90 = memref.load %arg0[%c18] : memref<33xf32, #tpu.memory_space<smem>>
    %91 = vector.broadcast %90 : f32 to vector<2x256xf32>
    %92 = arith.mulf %91, %89 : vector<2x256xf32>
    %93 = arith.addf %88, %92 : vector<2x256xf32>
    %c0_38 = arith.constant 0 : index
    %c9_39 = arith.constant 9 : index
    %94 = vector.load %arg2[%c0_38, %c9_39] : memref<2x273xf32, #tpu.memory_space<vmem>>, vector<2x256xf32>
    %c19 = arith.constant 19 : index
    %95 = memref.load %arg0[%c19] : memref<33xf32, #tpu.memory_space<smem>>
    %96 = vector.broadcast %95 : f32 to vector<2x256xf32>
    %97 = arith.mulf %96, %94 : vector<2x256xf32>
    %98 = arith.addf %93, %97 : vector<2x256xf32>
    %c0_40 = arith.constant 0 : index
    %c10_41 = arith.constant 10 : index
    %99 = vector.load %arg1[%c0_40, %c10_41] : memref<2x273xf32, #tpu.memory_space<vmem>>, vector<2x256xf32>
    %c20 = arith.constant 20 : index
    %100 = memref.load %arg0[%c20] : memref<33xf32, #tpu.memory_space<smem>>
    %101 = vector.broadcast %100 : f32 to vector<2x256xf32>
    %102 = arith.mulf %101, %99 : vector<2x256xf32>
    %103 = arith.addf %98, %102 : vector<2x256xf32>
    %c0_42 = arith.constant 0 : index
    %c10_43 = arith.constant 10 : index
    %104 = vector.load %arg2[%c0_42, %c10_43] : memref<2x273xf32, #tpu.memory_space<vmem>>, vector<2x256xf32>
    %c21 = arith.constant 21 : index
    %105 = memref.load %arg0[%c21] : memref<33xf32, #tpu.memory_space<smem>>
    %106 = vector.broadcast %105 : f32 to vector<2x256xf32>
    %107 = arith.mulf %106, %104 : vector<2x256xf32>
    %108 = arith.addf %103, %107 : vector<2x256xf32>
    %c0_44 = arith.constant 0 : index
    %c11_45 = arith.constant 11 : index
    %109 = vector.load %arg1[%c0_44, %c11_45] : memref<2x273xf32, #tpu.memory_space<vmem>>, vector<2x256xf32>
    %c22 = arith.constant 22 : index
    %110 = memref.load %arg0[%c22] : memref<33xf32, #tpu.memory_space<smem>>
    %111 = vector.broadcast %110 : f32 to vector<2x256xf32>
    %112 = arith.mulf %111, %109 : vector<2x256xf32>
    %113 = arith.addf %108, %112 : vector<2x256xf32>
    %c0_46 = arith.constant 0 : index
    %c11_47 = arith.constant 11 : index
    %114 = vector.load %arg2[%c0_46, %c11_47] : memref<2x273xf32, #tpu.memory_space<vmem>>, vector<2x256xf32>
    %c23 = arith.constant 23 : index
    %115 = memref.load %arg0[%c23] : memref<33xf32, #tpu.memory_space<smem>>
    %116 = vector.broadcast %115 : f32 to vector<2x256xf32>
    %117 = arith.mulf %116, %114 : vector<2x256xf32>
    %118 = arith.addf %113, %117 : vector<2x256xf32>
    %c0_48 = arith.constant 0 : index
    %c12_49 = arith.constant 12 : index
    %119 = vector.load %arg1[%c0_48, %c12_49] : memref<2x273xf32, #tpu.memory_space<vmem>>, vector<2x256xf32>
    %c24 = arith.constant 24 : index
    %120 = memref.load %arg0[%c24] : memref<33xf32, #tpu.memory_space<smem>>
    %121 = vector.broadcast %120 : f32 to vector<2x256xf32>
    %122 = arith.mulf %121, %119 : vector<2x256xf32>
    %123 = arith.addf %118, %122 : vector<2x256xf32>
    %c0_50 = arith.constant 0 : index
    %c12_51 = arith.constant 12 : index
    %124 = vector.load %arg2[%c0_50, %c12_51] : memref<2x273xf32, #tpu.memory_space<vmem>>, vector<2x256xf32>
    %c25 = arith.constant 25 : index
    %125 = memref.load %arg0[%c25] : memref<33xf32, #tpu.memory_space<smem>>
    %126 = vector.broadcast %125 : f32 to vector<2x256xf32>
    %127 = arith.mulf %126, %124 : vector<2x256xf32>
    %128 = arith.addf %123, %127 : vector<2x256xf32>
    %c0_52 = arith.constant 0 : index
    %c13_53 = arith.constant 13 : index
    %129 = vector.load %arg1[%c0_52, %c13_53] : memref<2x273xf32, #tpu.memory_space<vmem>>, vector<2x256xf32>
    %c26 = arith.constant 26 : index
    %130 = memref.load %arg0[%c26] : memref<33xf32, #tpu.memory_space<smem>>
    %131 = vector.broadcast %130 : f32 to vector<2x256xf32>
    %132 = arith.mulf %131, %129 : vector<2x256xf32>
    %133 = arith.addf %128, %132 : vector<2x256xf32>
    %c0_54 = arith.constant 0 : index
    %c13_55 = arith.constant 13 : index
    %134 = vector.load %arg2[%c0_54, %c13_55] : memref<2x273xf32, #tpu.memory_space<vmem>>, vector<2x256xf32>
    %c27 = arith.constant 27 : index
    %135 = memref.load %arg0[%c27] : memref<33xf32, #tpu.memory_space<smem>>
    %136 = vector.broadcast %135 : f32 to vector<2x256xf32>
    %137 = arith.mulf %136, %134 : vector<2x256xf32>
    %138 = arith.addf %133, %137 : vector<2x256xf32>
    %c0_56 = arith.constant 0 : index
    %c14_57 = arith.constant 14 : index
    %139 = vector.load %arg1[%c0_56, %c14_57] : memref<2x273xf32, #tpu.memory_space<vmem>>, vector<2x256xf32>
    %c28 = arith.constant 28 : index
    %140 = memref.load %arg0[%c28] : memref<33xf32, #tpu.memory_space<smem>>
    %141 = vector.broadcast %140 : f32 to vector<2x256xf32>
    %142 = arith.mulf %141, %139 : vector<2x256xf32>
    %143 = arith.addf %138, %142 : vector<2x256xf32>
    %c0_58 = arith.constant 0 : index
    %c14_59 = arith.constant 14 : index
    %144 = vector.load %arg2[%c0_58, %c14_59] : memref<2x273xf32, #tpu.memory_space<vmem>>, vector<2x256xf32>
    %c29 = arith.constant 29 : index
    %145 = memref.load %arg0[%c29] : memref<33xf32, #tpu.memory_space<smem>>
    %146 = vector.broadcast %145 : f32 to vector<2x256xf32>
    %147 = arith.mulf %146, %144 : vector<2x256xf32>
    %148 = arith.addf %143, %147 : vector<2x256xf32>
    %c0_60 = arith.constant 0 : index
    %c15_61 = arith.constant 15 : index
    %149 = vector.load %arg1[%c0_60, %c15_61] : memref<2x273xf32, #tpu.memory_space<vmem>>, vector<2x256xf32>
    %c30 = arith.constant 30 : index
    %150 = memref.load %arg0[%c30] : memref<33xf32, #tpu.memory_space<smem>>
    %151 = vector.broadcast %150 : f32 to vector<2x256xf32>
    %152 = arith.mulf %151, %149 : vector<2x256xf32>
    %153 = arith.addf %148, %152 : vector<2x256xf32>
    %c0_62 = arith.constant 0 : index
    %c15_63 = arith.constant 15 : index
    %154 = vector.load %arg2[%c0_62, %c15_63] : memref<2x273xf32, #tpu.memory_space<vmem>>, vector<2x256xf32>
    %c31 = arith.constant 31 : index
    %155 = memref.load %arg0[%c31] : memref<33xf32, #tpu.memory_space<smem>>
    %156 = vector.broadcast %155 : f32 to vector<2x256xf32>
    %157 = arith.mulf %156, %154 : vector<2x256xf32>
    %158 = arith.addf %153, %157 : vector<2x256xf32>
    %c0_64 = arith.constant 0 : index
    %c16_65 = arith.constant 16 : index
    %159 = vector.load %arg1[%c0_64, %c16_65] : memref<2x273xf32, #tpu.memory_space<vmem>>, vector<2x256xf32>
    %c32 = arith.constant 32 : index
    %160 = memref.load %arg0[%c32] : memref<33xf32, #tpu.memory_space<smem>>
    %161 = vector.broadcast %160 : f32 to vector<2x256xf32>
    %162 = arith.mulf %161, %159 : vector<2x256xf32>
    %163 = arith.addf %158, %162 : vector<2x256xf32>
    %c0_66 = arith.constant 0 : index
    %c0_67 = arith.constant 0 : index
    %164 = vector.load %arg3[%c0_66, %c0_67] : memref<2x256xf32, #tpu.memory_space<vmem>>, vector<2x256xf32>
    tpu.vector_store %arg3[%c0_66, %c0_67], %163 {strides = array<i32>} : memref<2x256xf32, #tpu.memory_space<vmem>>, vector<2x256xf32>,
    return
  }
}

module attributes {stable_mosaic.version = 11 : i64} {
  func.func @_sepformer_kernel(%arg0: i32, %arg1: memref<64x16xf32, #tpu.memory_space<vmem>>, %arg2: memref<16x128xbf16, #tpu.memory_space<vmem>>, %arg3: memref<1x128xf32, #tpu.memory_space<vmem>>, %arg4: memref<128x128xbf16, #tpu.memory_space<vmem>>, %arg5: memref<1x128xf32, #tpu.memory_space<vmem>>, %arg6: memref<128x1280xbf16, #tpu.memory_space<vmem>>, %arg7: memref<1x1280xf32, #tpu.memory_space<vmem>>, %arg8: memref<128x16xbf16, #tpu.memory_space<vmem>>, %arg9: memref<64x160xf32, #tpu.memory_space<vmem>>, %arg10: memref<64x128xf32, #tpu.memory_space<vmem>>) attributes {dimension_semantics = [#tpu.dimension_semantics<parallel>], iteration_bounds = array<i64: 1>, scalar_prefetch = 0 : i64, scratch_operands = 0 : i64, tpu.core_type = #tpu.core_type<tc>, window_params = [{transform_indices = @transform_0, window_bounds = array<i64: 64, 16>}, {pipeline_mode = #tpu.pipeline_mode<synchronous>, transform_indices = @transform_1, window_bounds = array<i64: 16, 128>}, {pipeline_mode = #tpu.pipeline_mode<synchronous>, transform_indices = @transform_2, window_bounds = array<i64: 1, 128>}, {pipeline_mode = #tpu.pipeline_mode<synchronous>, transform_indices = @transform_3, window_bounds = array<i64: 128, 128>}, {pipeline_mode = #tpu.pipeline_mode<synchronous>, transform_indices = @transform_4, window_bounds = array<i64: 1, 128>}, {pipeline_mode = #tpu.pipeline_mode<synchronous>, transform_indices = @transform_5, window_bounds = array<i64: 128, 1280>}, {pipeline_mode = #tpu.pipeline_mode<synchronous>, transform_indices = @transform_6, window_bounds = array<i64: 1, 1280>}, {pipeline_mode = #tpu.pipeline_mode<synchronous>, transform_indices = @transform_7, window_bounds = array<i64: 128, 16>}, {transform_indices = @transform_8, window_bounds = array<i64: 64, 160>}, {transform_indices = @transform_9, window_bounds = array<i64: 64, 128>}]} {
    %c0 = arith.constant 0 : index
    %c0_0 = arith.constant 0 : index
    %0 = vector.load %arg1[%c0, %c0_0] : memref<64x16xf32, #tpu.memory_space<vmem>>, vector<64x16xf32>
    %1 = arith.truncf %0 : vector<64x16xf32> to vector<64x16xbf16>
    %c0_1 = arith.constant 0 : index
    %c0_2 = arith.constant 0 : index
    %2 = vector.load %arg2[%c0_1, %c0_2] : memref<16x128xbf16, #tpu.memory_space<vmem>>, vector<16x128xbf16>
    %cst = arith.constant dense<0.000000e+00> : vector<64x128xf32>
    %3 = tpu.matmul %1, %2, %cst {dimension_numbers = #tpu.dot_dimension_numbers<[1], [0], [0], [1], [0, 0, 1, 1], [], []>} : vector<64x16xbf16>, vector<16x128xbf16>, vector<64x128xf32> -> vector<64x128xf32>
    %c0_3 = arith.constant 0 : index
    %c0_4 = arith.constant 0 : index
    %4 = vector.load %arg3[%c0_3, %c0_4] : memref<1x128xf32, #tpu.memory_space<vmem>>, vector<1x128xf32>
    %5 = vector.broadcast %4 : vector<1x128xf32> to vector<64x128xf32>
    %6 = arith.addf %3, %5 : vector<64x128xf32>
    %cst_5 = arith.constant 0.000000e+00 : f32
    %7 = vector.broadcast %cst_5 : f32 to vector<64x128xf32>
    %8 = arith.maximumf %6, %7 : vector<64x128xf32>
    %9 = arith.truncf %8 : vector<64x128xf32> to vector<64x128xbf16>
    %c0_6 = arith.constant 0 : index
    %c0_7 = arith.constant 0 : index
    %10 = vector.load %arg4[%c0_6, %c0_7] : memref<128x128xbf16, #tpu.memory_space<vmem>>, vector<128x128xbf16>
    %cst_8 = arith.constant dense<0.000000e+00> : vector<64x128xf32>
    %11 = tpu.matmul %9, %10, %cst_8 {dimension_numbers = #tpu.dot_dimension_numbers<[1], [0], [0], [1], [0, 0, 1, 1], [], []>} : vector<64x128xbf16>, vector<128x128xbf16>, vector<64x128xf32> -> vector<64x128xf32>
    %c0_9 = arith.constant 0 : index
    %c0_10 = arith.constant 0 : index
    %12 = vector.load %arg5[%c0_9, %c0_10] : memref<1x128xf32, #tpu.memory_space<vmem>>, vector<1x128xf32>
    %13 = vector.broadcast %12 : vector<1x128xf32> to vector<64x128xf32>
    %14 = arith.addf %11, %13 : vector<64x128xf32>
    %cst_11 = arith.constant 0.000000e+00 : f32
    %15 = vector.broadcast %cst_11 : f32 to vector<64x128xf32>
    %16 = arith.maximumf %14, %15 : vector<64x128xf32>
    %17 = arith.truncf %16 : vector<64x128xf32> to vector<64x128xbf16>
    %c0_12 = arith.constant 0 : index
    %c0_13 = arith.constant 0 : index
    %18 = vector.load %arg6[%c0_12, %c0_13] : memref<128x1280xbf16, #tpu.memory_space<vmem>>, vector<128x1280xbf16>
    %cst_14 = arith.constant dense<0.000000e+00> : vector<64x1280xf32>
    %19 = tpu.matmul %17, %18, %cst_14 {dimension_numbers = #tpu.dot_dimension_numbers<[1], [0], [0], [1], [0, 0, 1, 1], [], []>} : vector<64x128xbf16>, vector<128x1280xbf16>, vector<64x1280xf32> -> vector<64x1280xf32>
    %c0_15 = arith.constant 0 : index
    %c0_16 = arith.constant 0 : index
    %20 = vector.load %arg7[%c0_15, %c0_16] : memref<1x1280xf32, #tpu.memory_space<vmem>>, vector<1x1280xf32>
    %21 = vector.broadcast %20 : vector<1x1280xf32> to vector<64x1280xf32>
    %22 = arith.addf %19, %21 : vector<64x1280xf32>
    %cst_17 = arith.constant 0.000000e+00 : f32
    %23 = vector.broadcast %cst_17 : f32 to vector<64x1280xf32>
    %24 = arith.maximumf %22, %23 : vector<64x1280xf32>
    %25 = vector.extract_strided_slice %24 {offsets = [0, 0], sizes = [64, 128], strides = [1, 1]} : vector<64x1280xf32> to vector<64x128xf32>
    %26 = arith.mulf %8, %25 : vector<64x128xf32>
    %27 = vector.extract_strided_slice %24 {offsets = [0, 128], sizes = [64, 128], strides = [1, 1]} : vector<64x1280xf32> to vector<64x128xf32>
    %28 = arith.mulf %8, %27 : vector<64x128xf32>
    %29 = vector.extract_strided_slice %24 {offsets = [0, 256], sizes = [64, 128], strides = [1, 1]} : vector<64x1280xf32> to vector<64x128xf32>
    %30 = arith.mulf %8, %29 : vector<64x128xf32>
    %31 = vector.extract_strided_slice %24 {offsets = [0, 384], sizes = [64, 128], strides = [1, 1]} : vector<64x1280xf32> to vector<64x128xf32>
    %32 = arith.mulf %8, %31 : vector<64x128xf32>
    %33 = vector.extract_strided_slice %24 {offsets = [0, 512], sizes = [64, 128], strides = [1, 1]} : vector<64x1280xf32> to vector<64x128xf32>
    %34 = arith.mulf %8, %33 : vector<64x128xf32>
    %35 = vector.extract_strided_slice %24 {offsets = [0, 640], sizes = [64, 128], strides = [1, 1]} : vector<64x1280xf32> to vector<64x128xf32>
    %36 = arith.mulf %8, %35 : vector<64x128xf32>
    %37 = vector.extract_strided_slice %24 {offsets = [0, 768], sizes = [64, 128], strides = [1, 1]} : vector<64x1280xf32> to vector<64x128xf32>
    %38 = arith.mulf %8, %37 : vector<64x128xf32>
    %39 = vector.extract_strided_slice %24 {offsets = [0, 896], sizes = [64, 128], strides = [1, 1]} : vector<64x1280xf32> to vector<64x128xf32>
    %40 = arith.mulf %8, %39 : vector<64x128xf32>
    %41 = vector.extract_strided_slice %24 {offsets = [0, 1024], sizes = [64, 128], strides = [1, 1]} : vector<64x1280xf32> to vector<64x128xf32>
    %42 = arith.mulf %8, %41 : vector<64x128xf32>
    %43 = vector.extract_strided_slice %24 {offsets = [0, 1152], sizes = [64, 128], strides = [1, 1]} : vector<64x1280xf32> to vector<64x128xf32>
    %44 = arith.mulf %8, %43 : vector<64x128xf32>
    %45 = tpu.concatenate %26, %28, %30, %32, %34, %36, %38, %40, %42, %44 in 0 : vector<64x128xf32>, vector<64x128xf32>, vector<64x128xf32>, vector<64x128xf32>, vector<64x128xf32>, vector<64x128xf32>, vector<64x128xf32>, vector<64x128xf32>, vector<64x128xf32>, vector<64x128xf32> -> vector<640x128xf32>
    %46 = arith.truncf %45 : vector<640x128xf32> to vector<640x128xbf16>
    %c0_18 = arith.constant 0 : index
    %c0_19 = arith.constant 0 : index
    %47 = vector.load %arg8[%c0_18, %c0_19] : memref<128x16xbf16, #tpu.memory_space<vmem>>, vector<128x16xbf16>
    %cst_20 = arith.constant dense<0.000000e+00> : vector<640x16xf32>
    %48 = tpu.matmul %46, %47, %cst_20 {dimension_numbers = #tpu.dot_dimension_numbers<[1], [0], [0], [1], [0, 0, 1, 1], [], []>} : vector<640x128xbf16>, vector<128x16xbf16>, vector<640x16xf32> -> vector<640x16xf32>
    %49 = vector.extract_strided_slice %48 {offsets = [0, 0], sizes = [64, 16], strides = [1, 1]} : vector<640x16xf32> to vector<64x16xf32>
    %50 = vector.extract_strided_slice %48 {offsets = [64, 0], sizes = [64, 16], strides = [1, 1]} : vector<640x16xf32> to vector<64x16xf32>
    %51 = vector.extract_strided_slice %48 {offsets = [128, 0], sizes = [64, 16], strides = [1, 1]} : vector<640x16xf32> to vector<64x16xf32>
    %52 = vector.extract_strided_slice %48 {offsets = [192, 0], sizes = [64, 16], strides = [1, 1]} : vector<640x16xf32> to vector<64x16xf32>
    %53 = vector.extract_strided_slice %48 {offsets = [256, 0], sizes = [64, 16], strides = [1, 1]} : vector<640x16xf32> to vector<64x16xf32>
    %54 = vector.extract_strided_slice %48 {offsets = [320, 0], sizes = [64, 16], strides = [1, 1]} : vector<640x16xf32> to vector<64x16xf32>
    %55 = vector.extract_strided_slice %48 {offsets = [384, 0], sizes = [64, 16], strides = [1, 1]} : vector<640x16xf32> to vector<64x16xf32>
    %56 = vector.extract_strided_slice %48 {offsets = [448, 0], sizes = [64, 16], strides = [1, 1]} : vector<640x16xf32> to vector<64x16xf32>
    %57 = vector.extract_strided_slice %48 {offsets = [512, 0], sizes = [64, 16], strides = [1, 1]} : vector<640x16xf32> to vector<64x16xf32>
    %58 = vector.extract_strided_slice %48 {offsets = [576, 0], sizes = [64, 16], strides = [1, 1]} : vector<640x16xf32> to vector<64x16xf32>
    %59 = tpu.concatenate %49, %50, %51, %52, %53, %54, %55, %56, %57, %58 in 1 : vector<64x16xf32>, vector<64x16xf32>, vector<64x16xf32>, vector<64x16xf32>, vector<64x16xf32>, vector<64x16xf32>, vector<64x16xf32>, vector<64x16xf32>, vector<64x16xf32>, vector<64x16xf32> -> vector<64x160xf32>
    %c0_21 = arith.constant 0 : index
    %c0_22 = arith.constant 0 : index
    %60 = vector.load %arg9[%c0_21, %c0_22] : memref<64x160xf32, #tpu.memory_space<vmem>>, vector<64x160xf32>
    tpu.vector_store %arg9[%c0_21, %c0_22], %59 {strides = array<i32>} : memref<64x160xf32, #tpu.memory_space<vmem>>, vector<64x160xf32>,
    %c0_23 = arith.constant 0 : index
    %c0_24 = arith.constant 0 : index
    %61 = vector.load %arg10[%c0_23, %c0_24] : memref<64x128xf32, #tpu.memory_space<vmem>>, vector<64x128xf32>
    tpu.vector_store %arg10[%c0_23, %c0_24], %8 {strides = array<i32>} : memref<64x128xf32, #tpu.memory_space<vmem>>, vector<64x128xf32>,
    return
  }
  func.func @transform_0(%arg0: i32) -> (i32, i32) {
    %c0_i32 = arith.constant 0 : i32
    %c0_i32_0 = arith.constant 0 : i32
    return %arg0, %c0_i32 : i32, i32
  }
  func.func @transform_1(%arg0: i32) -> (i32, i32) {
    %c0_i32 = arith.constant 0 : i32
    %c0_i32_0 = arith.constant 0 : i32
    %c0_i32_1 = arith.constant 0 : i32
    return %c0_i32, %c0_i32_0 : i32, i32
  }
  func.func @transform_2(%arg0: i32) -> (i32, i32) {
    %c0_i32 = arith.constant 0 : i32
    %c0_i32_0 = arith.constant 0 : i32
    %c0_i32_1 = arith.constant 0 : i32
    return %c0_i32, %c0_i32_0 : i32, i32
  }
  func.func @transform_3(%arg0: i32) -> (i32, i32) {
    %c0_i32 = arith.constant 0 : i32
    %c0_i32_0 = arith.constant 0 : i32
    %c0_i32_1 = arith.constant 0 : i32
    return %c0_i32, %c0_i32_0 : i32, i32
  }
  func.func @transform_4(%arg0: i32) -> (i32, i32) {
    %c0_i32 = arith.constant 0 : i32
    %c0_i32_0 = arith.constant 0 : i32
    %c0_i32_1 = arith.constant 0 : i32
    return %c0_i32, %c0_i32_0 : i32, i32
  }
  func.func @transform_5(%arg0: i32) -> (i32, i32) {
    %c0_i32 = arith.constant 0 : i32
    %c0_i32_0 = arith.constant 0 : i32
    %c0_i32_1 = arith.constant 0 : i32
    return %c0_i32, %c0_i32_0 : i32, i32
  }
  func.func @transform_6(%arg0: i32) -> (i32, i32) {
    %c0_i32 = arith.constant 0 : i32
    %c0_i32_0 = arith.constant 0 : i32
    %c0_i32_1 = arith.constant 0 : i32
    return %c0_i32, %c0_i32_0 : i32, i32
  }
  func.func @transform_7(%arg0: i32) -> (i32, i32) {
    %c0_i32 = arith.constant 0 : i32
    %c0_i32_0 = arith.constant 0 : i32
    %c0_i32_1 = arith.constant 0 : i32
    return %c0_i32, %c0_i32_0 : i32, i32
  }
  func.func @transform_8(%arg0: i32) -> (i32, i32) {
    %c0_i32 = arith.constant 0 : i32
    %c0_i32_0 = arith.constant 0 : i32
    return %arg0, %c0_i32 : i32, i32
  }
  func.func @transform_9(%arg0: i32) -> (i32, i32) {
    %c0_i32 = arith.constant 0 : i32
    %c0_i32_0 = arith.constant 0 : i32
    return %arg0, %c0_i32 : i32, i32
  }
}

</mosaic_0001>

<bundles_post_ra>
// kernel: sepformer_forward.2
= control target key start
LH: loop header
LB: loop body
LE: loop exit
PB: predicated region body
PF: predicated region fallthrough
CT: control target
= control target key end

     0   :  { %8 = vsyncpa [#allocation3], 0  ;;  %s433_s15 = smov [#allocation2]   ;;  %s523_s0 = inlined_call_operand.vmem [shape: f32[33], index: 0, kind: input, shape index: {}]   ;;  %s524_s1 = inlined_call_operand.vmem [shape: f32[2,273], index: 1, kind: input, shape index: {}]   ;;  %s525_s2 = inlined_call_operand.vmem [shape: f32[2,273], index: 2, kind: input, shape index: {}]   ;;  %s526_s3 = inlined_call_operand.vmem [shape: f32[2,256], index: 3, kind: output, shape index: {}]  }
   0x1   :  { %s14_s14 = sshll.u32 %s523_s0, 4  ;;  %s15_s14 = int_to_ptr.vmem [resolvable:$true] %s14_s14 }
   0x2   :  { %17 = dma.vmem_to_smem %s15_s14, 16, %s433_s15, [#allocation3]  }
   0x3   :  { %431 = dma.done.wait [#allocation3], 16  }
   0x4   :  { %432 = vsyncadd [#allocation3], 4294967280 }
   0x5   :  { %26 = sfence }
   0x6   :  { %s371_s16 = sld [smem:[#allocation2 + $0x2]]  ;;  %v476_v0 = vld [vmem:[%s524_s1] sm:$0x3f]  ;;  %s434_s22 = smov 127   ;;  %vm44_vm0 = vcmask 1039360   ;;  %vm66_vm1 = vcmask 1031168  }
   0x7   :  { %s373_s17 = sld [smem:[#allocation2 + $0x4]]  ;;  %s435_s24 = smov 126   ;;  %v483_v5 = vld [vmem:[%s525_s2] sm:$0x3f]  ;;  %vm87_vm2 = vcmask 1022976   ;;  %vm108_vm3 = vcmask 1014784  }
   0x8   :  { %s372_s18 = sld [smem:[#allocation2 + $0x3]]  ;;  %s436_s30 = smov 125   ;;  %vm129_vm4 = vcmask 1006592   ;;  %vm150_vm5 = vcmask 998400   ;;  %vm171_vm6 = vcmask 990208   ;;  %vm192_vm7 = vcmask 982016  }
   0x9   :  { %s374_s19 = sld [smem:[#allocation2 + $0x5]]  ;;  %s437_s6 = smov 124   ;;  %vm213_vm8 = vcmask 973824   ;;  %vm234_vm9 = vcmask 965632   ;;  %vm255_vm10 = vcmask 957440   ;;  %vm276_vm11 = vcmask 949248  }
   0xa   :  { %s375_s0 = sld [smem:[#allocation2 + $0x6]]  ;;  %s438_s10 = smov 123   ;;  %vm297_vm12 = vcmask 941056   ;;  %vm318_vm13 = vcmask 932864   ;;  %vm339_vm14 = vcmask 924672   ;;  %vm360_vm15 = vcmask 916480  }
   0xb   :  { %s377_s23 = sld [smem:[#allocation2 + $0x8]]  ;;  %s439_s12 = smov 122  }
   0xc   :  { %v38_v1 = vstv %s371_s16  ;;  %s378_s27 = sld [smem:[#allocation2 + $0x9]]  ;;  %s440_s15 = smov 121  }
   0xd   :  { %v39_v2 = vmul.f32 %v38_v1, %v476_v0  ;;  %v60_v3 = vstv %s373_s17  ;;  %s376_s28 = sld [smem:[#allocation2 + $0x7]]  ;;  %s442_s21 = smov 119  }
   0xe   :  { %v61_v4 = vmul.f32 %v60_v3, %v476_v0  ;;  %v50_v6 = vstv %s372_s18  ;;  %s380_s29 = sld [smem:[#allocation2 + $0xb]]  ;;  %v28_v3 = vld [vmem:[%s524_s1] sm:$0xf] }
   0xf   :  { %41 = vrot.lane.b32.xlu0 %v39_v2, %s434_s22  ;;  %v71_v7 = vstv %s374_s19  ;;  %v51_v8 = vmul.f32 %v50_v6, %v483_v5  ;;  %s379_s4 = sld [smem:[#allocation2 + $0xa]]  ;;  %s441_s19 = smov 120   ;;  %v31_v6 = vld [vmem:[%s525_s2] sm:$0xf] }
  0x10   :  { %63 = vrot.lane.b32.xlu1 %v61_v4, %s435_s24  ;;  %v72_v9 = vmul.f32 %v71_v7, %v483_v5  ;;  %v81_v10 = vstv %s375_s0  ;;  %s381_s5 = sld [smem:[#allocation2 + $0xc]] }
  0x11   :  { %v82_v11 = vmul.f32 %v81_v10, %v476_v0  ;;  %v102_v12 = vstv %s377_s23  ;;  %s383_s7 = sld [smem:[#allocation2 + $0xe]]  ;;  %s443_s23 = smov 118  }
  0x12   :  { %v113_v14 = vstv %s378_s27  ;;  %v103_v15 = vmul.f32 %v102_v12, %v476_v0  ;;  %s382_s8 = sld [smem:[#allocation2 + $0xd]]  ;;  %s444_s27 = smov 117  }
  0x13   :  { %84 = vrot.lane.b32.xlu2 %v82_v11, %s436_s30  ;;  %v92_v13 = vstv %s376_s28  ;;  %v114_v17 = vmul.f32 %v113_v14, %v483_v5  ;;  %s384_s9 = sld [smem:[#allocation2 + $0xf]] }
  0x14   :  { %v93_v16 = vmul.f32 %v92_v13, %v483_v5  ;;  %v134_v18 = vstv %s380_s29  ;;  %s386_s11 = sld [smem:[#allocation2 + $0x11]]  ;;  %s445_s29 = smov 116  }
  0x15   :  { %v123_v19 = vstv %s379_s4  ;;  %v135_v21 = vmul.f32 %v134_v18, %v483_v5  ;;  %s385_s13 = sld [smem:[#allocation2 + $0x10]] }
  0x16   :  { %v144_v20 = vstv %s381_s5  ;;  %v124_v22 = vmul.f32 %v123_v19, %v476_v0  ;;  %s387_s14 = sld [smem:[#allocation2 + $0x12]]  ;;  %s446_s5 = smov 115  }
  0x17   :  { %53 = vrot.lane.b32.xlu0 %v51_v8, %s434_s22  ;;  %v145_v23 = vmul.f32 %v144_v20, %v476_v0  ;;  %v165_v24 = vstv %s383_s7  ;;  %s389_s16 = sld [smem:[#allocation2 + $0x14]] }
  0x18   :  { %74 = vrot.lane.b32.xlu1 %v72_v9, %s435_s24  ;;  %v155_v25 = vstv %s382_s8  ;;  %v166_v27 = vmul.f32 %v165_v24, %v476_v0  ;;  %s388_s17 = sld [smem:[#allocation2 + $0x13]]  ;;  %s447_s8 = smov 114  }
  0x19   :  { %v176_v26 = vstv %s384_s9  ;;  %v156_v28 = vmul.f32 %v155_v25, %v483_v5  ;;  %s390_s18 = sld [smem:[#allocation2 + $0x15]]  ;;  %s448_s9 = smov 113  }
  0x1a   :  { %v177_v29 = vmul.f32 %v176_v26, %v483_v5  ;;  %v197_v30 = vstv %s386_s11  ;;  %s392_s20 = sld [smem:[#allocation2 + $0x17]] }
  0x1b   :  { %95 = vrot.lane.b32.xlu2 %v93_v16, %s436_s30  ;;  %v186_v31 = vstv %s385_s13  ;;  %v198_v33 = vmul.f32 %v197_v30, %v483_v5  ;;  %s391_s0 = sld [smem:[#allocation2 + $0x16]] }
  0x1c   :  { %v207_v32 = vstv %s387_s14  ;;  %v187_v34 = vmul.f32 %v186_v31, %v476_v0  ;;  %s393_s22 = sld [smem:[#allocation2 + $0x18]] }
  0x1d   :  { %v208_v35 = vmul.f32 %v207_v32, %v476_v0  ;;  %v228_v36 = vstv %s389_s16  ;;  %s395_s24 = sld [smem:[#allocation2 + $0x1a]] }
  0x1e   :  { %v218_v37 = vstv %s388_s17  ;;  %v229_v39 = vmul.f32 %v228_v36, %v476_v0  ;;  %s394_s25 = sld [smem:[#allocation2 + $0x19]] }
  0x1f   :  { %105 = vrot.lane.b32.xlu0 %v103_v15, %s437_s6  ;;  %v239_v38 = vstv %s390_s18  ;;  %v219_v40 = vmul.f32 %v218_v37, %v483_v5  ;;  %s396_s26 = sld [smem:[#allocation2 + $0x1b]] }
  0x20   :  { %116 = vrot.lane.b32.xlu1 %v114_v17, %s437_s6  ;;  %v240_v41 = vmul.f32 %v239_v38, %v483_v5  ;;  %v260_v42 = vstv %s392_s20  ;;  %s398_s28 = sld [smem:[#allocation2 + $0x1d]] }
  0x21   :  { %v249_v43 = vstv %s391_s0  ;;  %v261_v45 = vmul.f32 %v260_v42, %v483_v5  ;;  %s397_s30 = sld [smem:[#allocation2 + $0x1c]] }
  0x22   :  { %v270_v44 = vstv %s393_s22  ;;  %v250_v46 = vmul.f32 %v249_v43, %v476_v0  ;;  %s399_s4 = sld [smem:[#allocation2 + $0x1e]] }
  0x23   :  { %126 = vrot.lane.b32.xlu2 %v124_v22, %s438_s10  ;;  %v271_v47 = vmul.f32 %v270_v44, %v476_v0  ;;  %v291_v48 = vstv %s395_s24  ;;  %s401_s6 = sld [smem:[#allocation2 + $0x20]] }
  0x24   :  { %v281_v49 = vstv %s394_s25  ;;  %v292_v51 = vmul.f32 %v291_v48, %v476_v0  ;;  %s400_s7 = sld [smem:[#allocation2 + $0x1f]] }
  0x25   :  { %v302_v50 = vstv %s396_s26  ;;  %v282_v52 = vmul.f32 %v281_v49, %v483_v5  ;;  %s27_s11 = sld [smem:[#allocation2]] }
  0x26   :  { %v303_v53 = vmul.f32 %v302_v50, %v483_v5  ;;  %v323_v54 = vstv %s398_s28 }
  0x27   :  { %137 = vrot.lane.b32.xlu0 %v135_v21, %s438_s10  ;;  %v312_v55 = vstv %s397_s30  ;;  %v324_v57 = vmul.f32 %v323_v54, %v483_v5  ;;  %s449_s10 = smov 112  }
  0x28   :  { %147 = vrot.lane.b32.xlu1 %v145_v23, %s439_s12  ;;  %v333_v56 = vstv %s399_s4  ;;  %v313_v58 = vmul.f32 %v312_v55, %v476_v0 }
  0x29   :  { %v334_v59 = vmul.f32 %v333_v56, %v476_v0  ;;  %v354_v60 = vstv %s401_s6 }
  0x2a   :  { %v344_v61 = vstv %s400_s7  ;;  %v355_v62 = vmul.f32 %v354_v60, %v476_v0 }
  0x2b   :  { %158 = vrot.lane.b32.xlu2 %v156_v28, %s439_s12  ;;  %v345_v63 = vmul.f32 %v344_v61, %v483_v5  ;;  %s370_s12 = sld [smem:[#allocation2 + $0x1]]  ;;  %v29_v4 = vstv %s27_s11 }
  0x2c   :  { %v30_v5 = vmul.f32 %v29_v4, %v28_v3 }
  0x2f   :  { %168 = vrot.lane.b32.xlu0 %v166_v27, %s440_s15 }
  0x30   :  { %179 = vrot.lane.b32.xlu1 %v177_v29, %s440_s15 }
  0x31   :  { %v33_v7 = vstv %s370_s12 }
  0x32   :  { %v34_v9 = vmul.f32 %v33_v7, %v31_v6 }
  0x33   :  { %189 = vrot.lane.b32.xlu2 %v187_v34, %s441_s19 }
  0x34   :  { %v35_v12 = vadd.f32 %v34_v9, %v30_v5 }
  0x37   :  { %200 = vrot.lane.b32.xlu0 %v198_v33, %s441_s19 }
  0x38   :  { %210 = vrot.lane.b32.xlu1 %v208_v35, %s442_s21 }
  0x3b   :  { %221 = vrot.lane.b32.xlu2 %v219_v40, %s442_s21 }
  0x3f   :  { %231 = vrot.lane.b32.xlu0 %v229_v39, %s443_s23 }
  0x40   :  { %242 = vrot.lane.b32.xlu1 %v240_v41, %s443_s23 }
  0x43   :  { %252 = vrot.lane.b32.xlu2 %v250_v46, %s444_s27 }
  0x47   :  { %263 = vrot.lane.b32.xlu0 %v261_v45, %s444_s27 }
  0x48   :  { %273 = vrot.lane.b32.xlu1 %v271_v47, %s445_s29 }
  0x4b   :  { %284 = vrot.lane.b32.xlu2 %v282_v52, %s445_s29 }
  0x4f   :  { %294 = vrot.lane.b32.xlu0 %v292_v51, %s446_s5 }
  0x50   :  { %305 = vrot.lane.b32.xlu1 %v303_v53, %s446_s5 }
  0x53   :  { %315 = vrot.lane.b32.xlu2 %v313_v58, %s447_s8 }
  0x57   :  { %326 = vrot.lane.b32.xlu0 %v324_v57, %s447_s8 }
  0x58   :  { %336 = vrot.lane.b32.xlu1 %v334_v59, %s448_s9 }
  0x5b   :  { %347 = vrot.lane.b32.xlu2 %v345_v63, %s448_s9 }
  0x5f   :  { %357 = vrot.lane.b32.xlu0 %v355_v62, %s449_s10 }
  0x6d   :  { %v85_v1 = vpop.permute.xlu2 %84 }
  0x6e   :  { %v86_v24 = vrot.slane %v85_v1, 2 }
  0x70   :  { %v88_v30 = vsel %vm87_vm2, %v85_v1, %v86_v24 }
  0x75   :  { %v96_v2 = vpop.permute.xlu2 %95 }
  0x76   :  { %v97_v27 = vrot.slane %v96_v2, 2 }
  0x78   :  { %v98_v34 = vsel %vm87_vm2, %v96_v2, %v97_v27 }
  0x7d   :  { %v127_v10 = vpop.permute.xlu2 %126 }
  0x7e   :  { %v128_v38 = vrot.slane %v127_v10, 2 }
  0x80   :  { %v130_v44 = vsel %vm129_vm4, %v127_v10, %v128_v38 }
  0x81   :  { %v42_v0 = vpop.permute.xlu0 %41 }
  0x82   :  { %v64_v8 = vpop.permute.xlu1 %63  ;;  %v43_v11 = vrot.slane %v42_v0, 2 }
  0x83   :  { %v65_v15 = vrot.slane %v64_v8, 2 }
  0x84   :  { %v45_v13 = vsel %vm44_vm0, %v42_v0, %v43_v11 }
  0x85   :  { %v47_v18 = vadd.f32 %v45_v13, %v35_v12  ;;  %v159_v22 = vpop.permute.xlu2 %158  ;;  %v67_v23 = vsel %vm66_vm1, %v64_v8, %v65_v15 }
  0x86   :  { %v160_v50 = vrot.slane %v159_v22, 2 }
  0x88   :  { %v161_v54 = vsel %vm150_vm5, %v159_v22, %v160_v50 }
  0x89   :  { %v54_v14 = vpop.permute.xlu0 %53 }
  0x8a   :  { %v55_v16 = vrot.slane %v54_v14, 2  ;;  %v75_v17 = vpop.permute.xlu1 %74 }
  0x8b   :  { %v76_v20 = vrot.slane %v75_v17, 2 }
  0x8c   :  { %v56_v19 = vsel %vm44_vm0, %v54_v14, %v55_v16 }
  0x8d   :  { %v58_v21 = vadd.f32 %v56_v19, %v47_v18  ;;  %v77_v26 = vsel %vm66_vm1, %v75_v17, %v76_v20  ;;  %v190_v40 = vpop.permute.xlu2 %189 }
  0x8e   :  { %v191_v62 = vrot.slane %v190_v40, 2 }
  0x8f   :  { %v69_v25 = vadd.f32 %v67_v23, %v58_v21 }
  0x90   :  { %v193_v3 = vsel %vm192_vm7, %v190_v40, %v191_v62 }
  0x91   :  { %v79_v28 = vadd.f32 %v77_v26, %v69_v25  ;;  %v106_v29 = vpop.permute.xlu0 %105 }
  0x92   :  { %v107_v31 = vrot.slane %v106_v29, 2  ;;  %v117_v32 = vpop.permute.xlu1 %116 }
  0x93   :  { %v90_v33 = vadd.f32 %v88_v30, %v79_v28  ;;  %v118_v35 = vrot.slane %v117_v32, 2 }
  0x94   :  { %v109_v37 = vsel %vm108_vm3, %v106_v29, %v107_v31 }
  0x95   :  { %v100_v36 = vadd.f32 %v98_v34, %v90_v33  ;;  %v119_v41 = vsel %vm108_vm3, %v117_v32, %v118_v35  ;;  %v222_v56 = vpop.permute.xlu2 %221 }
  0x96   :  { %v223_v10 = vrot.slane %v222_v56, 2 }
  0x97   :  { %v111_v39 = vadd.f32 %v109_v37, %v100_v36 }
  0x98   :  { %v224_v14 = vsel %vm213_vm8, %v222_v56, %v223_v10 }
  0x99   :  { %v121_v42 = vadd.f32 %v119_v41, %v111_v39  ;;  %v138_v43 = vpop.permute.xlu0 %137 }
  0x9a   :  { %v139_v45 = vrot.slane %v138_v43, 2  ;;  %v148_v46 = vpop.permute.xlu1 %147 }
  0x9b   :  { %v132_v47 = vadd.f32 %v130_v44, %v121_v42  ;;  %v149_v48 = vrot.slane %v148_v46, 2 }
  0x9c   :  { %v140_v49 = vsel %vm129_vm4, %v138_v43, %v139_v45 }
  0x9d   :  { %v142_v51 = vadd.f32 %v140_v49, %v132_v47  ;;  %v151_v52 = vsel %vm150_vm5, %v148_v46, %v149_v48  ;;  %v253_v5 = vpop.permute.xlu2 %252 }
  0x9e   :  { %v254_v21 = vrot.slane %v253_v5, 2 }
  0x9f   :  { %v153_v53 = vadd.f32 %v151_v52, %v142_v51 }
  0xa0   :  { %v256_v26 = vsel %vm255_vm10, %v253_v5, %v254_v21 }
  0xa1   :  { %v169_v55 = vpop.permute.xlu0 %168  ;;  %v163_v59 = vadd.f32 %v161_v54, %v153_v53 }
  0xa2   :  { %v170_v57 = vrot.slane %v169_v55, 2  ;;  %v180_v58 = vpop.permute.xlu1 %179 }
  0xa3   :  { %v181_v60 = vrot.slane %v180_v58, 2 }
  0xa4   :  { %v172_v61 = vsel %vm171_vm6, %v169_v55, %v170_v57 }
  0xa5   :  { %v174_v63 = vadd.f32 %v172_v61, %v163_v59  ;;  %v182_v1 = vsel %vm171_vm6, %v180_v58, %v181_v60  ;;  %v285_v24 = vpop.permute.xlu2 %284 }
  0xa6   :  { %v286_v33 = vrot.slane %v285_v24, 2 }
  0xa7   :  { %v184_v2 = vadd.f32 %v182_v1, %v174_v63 }
  0xa8   :  { %v287_v38 = vsel %vm276_vm11, %v285_v24, %v286_v33 }
  0xa9   :  { %v201_v4 = vpop.permute.xlu0 %200  ;;  %v195_v0 = vadd.f32 %v193_v3, %v184_v2 }
  0xaa   :  { %v202_v6 = vrot.slane %v201_v4, 2  ;;  %v211_v7 = vpop.permute.xlu1 %210 }
  0xab   :  { %v212_v8 = vrot.slane %v211_v7, 2 }
  0xac   :  { %v203_v9 = vsel %vm192_vm7, %v201_v4, %v202_v6 }
  0xad   :  { %v205_v11 = vadd.f32 %v203_v9, %v195_v0  ;;  %v214_v12 = vsel %vm213_vm8, %v211_v7, %v212_v8  ;;  %v316_v37 = vpop.permute.xlu2 %315 }
  0xae   :  { %v317_v45 = vrot.slane %v316_v37, 2 }
  0xaf   :  { %v216_v13 = vadd.f32 %v214_v12, %v205_v11 }
  0xb0   :  { %v319_v49 = vsel %vm318_vm13, %v316_v37, %v317_v45 }
  0xb1   :  { %v232_v15 = vpop.permute.xlu0 %231  ;;  %v226_v18 = vadd.f32 %v224_v14, %v216_v13 }
  0xb2   :  { %v233_v16 = vrot.slane %v232_v15, 2  ;;  %v243_v17 = vpop.permute.xlu1 %242 }
  0xb3   :  { %v244_v19 = vrot.slane %v243_v17, 2 }
  0xb4   :  { %v235_v20 = vsel %vm234_vm9, %v232_v15, %v233_v16 }
  0xb5   :  { %v237_v22 = vadd.f32 %v235_v20, %v226_v18  ;;  %v245_v23 = vsel %vm234_vm9, %v243_v17, %v244_v19  ;;  %v348_v51 = vpop.permute.xlu2 %347 }
  0xb6   :  { %v349_v57 = vrot.slane %v348_v51, 2 }
  0xb7   :  { %v247_v25 = vadd.f32 %v245_v23, %v237_v22 }
  0xb8   :  { %v350_v61 = vsel %vm339_vm14, %v348_v51, %v349_v57 }
  0xb9   :  { %v264_v27 = vpop.permute.xlu0 %263  ;;  %v258_v30 = vadd.f32 %v256_v26, %v247_v25 }
  0xba   :  { %v265_v28 = vrot.slane %v264_v27, 2  ;;  %v274_v29 = vpop.permute.xlu1 %273 }
  0xbb   :  { %v275_v31 = vrot.slane %v274_v29, 2 }
  0xbc   :  { %v266_v32 = vsel %vm255_vm10, %v264_v27, %v265_v28 }
  0xbd   :  { %v268_v34 = vadd.f32 %v266_v32, %v258_v30  ;;  %v277_v35 = vsel %vm276_vm11, %v274_v29, %v275_v31 }
  0xbf   :  { %v279_v36 = vadd.f32 %v277_v35, %v268_v34 }
  0xc1   :  { %v295_v39 = vpop.permute.xlu0 %294  ;;  %v289_v42 = vadd.f32 %v287_v38, %v279_v36 }
  0xc2   :  { %v296_v40 = vrot.slane %v295_v39, 2  ;;  %v306_v41 = vpop.permute.xlu1 %305 }
  0xc3   :  { %v307_v43 = vrot.slane %v306_v41, 2 }
  0xc4   :  { %v298_v44 = vsel %vm297_vm12, %v295_v39, %v296_v40 }
  0xc5   :  { %v300_v46 = vadd.f32 %v298_v44, %v289_v42  ;;  %v308_v47 = vsel %vm297_vm12, %v306_v41, %v307_v43 }
  0xc7   :  { %v310_v48 = vadd.f32 %v308_v47, %v300_v46 }
  0xc9   :  { %v327_v50 = vpop.permute.xlu0 %326  ;;  %v321_v54 = vadd.f32 %v319_v49, %v310_v48 }
  0xca   :  { %v328_v52 = vrot.slane %v327_v50, 2  ;;  %v337_v53 = vpop.permute.xlu1 %336 }
  0xcb   :  { %v338_v55 = vrot.slane %v337_v53, 2 }
  0xcc   :  { %v329_v56 = vsel %vm318_vm13, %v327_v50, %v328_v52 }
  0xcd   :  { %v331_v58 = vadd.f32 %v329_v56, %v321_v54  ;;  %v340_v59 = vsel %vm339_vm14, %v337_v53, %v338_v55 }
  0xcf   :  { %v342_v60 = vadd.f32 %v340_v59, %v331_v58 }
  0xd1   :  { %v358_v62 = vpop.permute.xlu0 %357  ;;  %v352_v1 = vadd.f32 %v350_v61, %v342_v60 }
  0xd2   :  { %v359_v63 = vrot.slane %v358_v62, 2 }
  0xd4   :  { %v361_v2 = vsel %vm360_vm15, %v358_v62, %v359_v63 }
  0xd5   :  { %v363_v3 = vadd.f32 %v361_v2, %v352_v1 }
  0xd7   :  { %364 = vst [vmem:[%s526_s3] sm:$0xf] %v363_v3 }
  0xd8   :  { %369 = vsyncpa [#allocation3], 1 }

// kernel: sepformer_forward.3
= control target key start
LH: loop header
LB: loop body
LE: loop exit
PB: predicated region body
PF: predicated region fallthrough
CT: control target
= control target key end

     0   :  { %vm56_vm0 = vcmask 130048   ;;  %s2376_s11 = smov 16   ;;  %s2377_s12 = smov 64   ;;  %vm1750_vm1 = vcmask 261120   ;;  %vm1759_vm2 = vcmask 392192   ;;  %vm1768_vm3 = vcmask 523264   ;;  %s3778_s1 = inlined_call_operand.vmem [shape: bf16[16,128], index: 1, kind: input, shape index: {}]   ;;  %s3779_s0 = inlined_call_operand.vmem [shape: f32[64,16], index: 0, kind: input, shape index: {}]   ;;  %s3780_s3 = inlined_call_operand.vmem [shape: bf16[128,128], index: 3, kind: input, shape index: {}]   ;;  %s3781_s2 = inlined_call_operand.vmem [shape: f32[1,128], index: 2, kind: input, shape index: {}]   ;;  %s3782_s4 = inlined_call_operand.vmem [shape: f32[1,128], index: 4, kind: input, shape index: {}]   ;;  %s3783_s9 = inlined_call_operand.vmem [shape: f32[64,128], index: 9, kind: output, shape index: {1}]   ;;  %s3784_s5 = inlined_call_operand.vmem [shape: bf16[128,1280], index: 5, kind: input, shape index: {}]   ;;  %s3785_s7 = inlined_call_operand.vmem [shape: bf16[128,16], index: 7, kind: input, shape index: {}]   ;;  %s3786_s6 = inlined_call_operand.vmem [shape: f32[1,1280], index: 6, kind: input, shape index: {}]   ;;  %s3787_s8 = inlined_call_operand.vmem [shape: f32[64,160], index: 8, kind: output, shape index: {0}]  }
   0x1   :  { %v2236_v0 = vld [vmem:[%s3778_s1] sm:$0xff]  ;;  %v33_v2 = vld [vmem:[%s3779_s0 + $0x8] sm:$0xff]  ;;  %v2244_v7 = vld [vmem:[%s3780_s3 + $0x38] sm:$0xff]  ;;  %s2378_s13 = smov 80   ;;  %s2379_s14 = smov 32   ;;  %vm1777_vm4 = vcmask 654336  }
   0x2   :  { %v32_v1 = vld [vmem:[%s3779_s0] sm:$0xff]  ;;  %76 = vmatpush.bf16.msra.mxu0 %v2236_v0  ;;  %2333 = vmatpush.bf16.msra.mxu3 %v2236_v0  ;;  %v37_v5 = vld [vmem:[%s3779_s0 + $0x28] sm:$0xff]  ;;  %v2243_v8 = vld [vmem:[%s3780_s3 + $0x30] sm:$0xff]  ;;  %s2380_s15 = smov 96   ;;  %vm1786_vm5 = vcmask 785408   ;;  %vm1795_vm6 = vcmask 916480  }
   0x3   :  { %v40_v3 = vpack.c.bf16 %v33_v2, %v32_v1  ;;  %v36_v4 = vld [vmem:[%s3779_s0 + $0x20] sm:$0xff]  ;;  %178 = vmatpush.bf16.msra.mxu1 %v2244_v7  ;;  %v2242_v9 = vld [vmem:[%s3780_s3 + $0x28] sm:$0xff]  ;;  %v34_v10 = vld [vmem:[%s3779_s0 + $0x10] sm:$0xff] }
   0x4   :  { %v42_v6 = vpack.c.bf16 %v37_v5, %v36_v4  ;;  %v35_v11 = vld [vmem:[%s3779_s0 + $0x18] sm:$0xff]  ;;  %v38_v12 = vld [vmem:[%s3779_s0 + $0x30] sm:$0xff]  ;;  %v2241_v14 = vld [vmem:[%s3780_s3 + $0x20] sm:$0xff] }
   0x5   :  { %1848 = vmatmul.msk.bf16.vlgmr.msra.gmra.mxu0 %vm56_vm0, %v40_v3  ;;  %v39_v13 = vld [vmem:[%s3779_s0 + $0x38] sm:$0xff]  ;;  %v41_v15 = vpack.c.bf16 %v35_v11, %v34_v10  ;;  %v2239_v18 = vld [vmem:[%s3780_s3 + $0x10] sm:$0xff]  ;;  %v2238_v19 = vld [vmem:[%s3780_s3 + $0x8] sm:$0xff] }
   0x6   :  { %1850 = vmatmul.msk.bf16.vlgmr.msra.gmra.mxu3 %vm56_vm0, %v42_v6  ;;  %v43_v16 = vpack.c.bf16 %v39_v13, %v38_v12  ;;  %v2240_v17 = vld [vmem:[%s3780_s3 + $0x18] sm:$0xff]  ;;  %v2237_v20 = vld [vmem:[%s3780_s3] sm:$0xff]  ;;  %v2315_v47 = vld [vmem:[%s3784_s5 + $0x234] sm:$0xf] }
   0x7   :  { %179 = vmatpush.bf16.msra.mxu1 %v2243_v8  ;;  %v2365_v21 = vld [vmem:[%s3781_s2] ss:$0 sm:$0xff]  ;;  %v2168_v48 = vld [vmem:[%s3784_s5 + $0x258] sm:$0xf0]  ;;  %v2166_v49 = vld [vmem:[%s3784_s5 + $0x230] sm:$0xf] }
   0x8   :  { %v2171_v50 = vor.u32 %v2315_v47, %v2168_v48  ;;  %v2320_v51 = vld [vmem:[%s3784_s5 + $0x254] sm:$0xf0]  ;;  %v2321_v53 = vld [vmem:[%s3784_s5 + $0x25c] sm:$0xf0]  ;;  %v2316_v57 = vld [vmem:[%s3784_s5 + $0x23c] sm:$0xf] }
   0x9   :  { %v2174_v52 = vld [vmem:[%s3784_s5 + $0x238] sm:$0xf]  ;;  %v2167_v55 = vor.u32 %v2320_v51, %v2166_v49  ;;  %v2176_v58 = vld [vmem:[%s3784_s5 + $0x260] sm:$0xf0]  ;;  %v2128_v61 = vld [vmem:[%s3784_s5 + $0x208] sm:$0xf0] }
   0xa   :  { %v2175_v56 = vor.u32 %v2321_v53, %v2174_v52  ;;  %752 = vmatpush.bf16.msrb.mxu3 %v2171_v50  ;;  %v2179_v59 = vor.u32 %v2316_v57, %v2176_v58  ;;  %v2305_v60 = vld [vmem:[%s3784_s5 + $0x1e4] sm:$0xf]  ;;  %v2126_v62 = vld [vmem:[%s3784_s5 + $0x1e0] sm:$0xf]  ;;  %v2310_v0 = vld [vmem:[%s3784_s5 + $0x204] sm:$0xf0] }
   0xb   :  { %180 = vmatpush.bf16.msra.mxu1 %v2242_v9  ;;  %723 = vmatpush.bf16.msra.mxu2 %v2167_v55  ;;  %v2131_v63 = vor.u32 %v2305_v60, %v2128_v61  ;;  %v2134_v1 = vld [vmem:[%s3784_s5 + $0x1e8] sm:$0xf]  ;;  %v2127_v2 = vor.u32 %v2310_v0, %v2126_v62  ;;  %v2311_v3 = vld [vmem:[%s3784_s5 + $0x20c] sm:$0xf0]  ;;  %v2306_v4 = vld [vmem:[%s3784_s5 + $0x1ec] sm:$0xf] }
   0xc   :  { %781 = vmatpush.bf16.msrb.mxu0 %v2175_v56  ;;  %v2136_v5 = vld [vmem:[%s3784_s5 + $0x210] sm:$0xf0]  ;;  %v2135_v6 = vor.u32 %v2311_v3, %v2134_v1  ;;  %v2088_v9 = vld [vmem:[%s3784_s5 + $0x1b8] sm:$0xf0]  ;;  %v2086_v10 = vld [vmem:[%s3784_s5 + $0x190] sm:$0xf] }
   0xd   :  { %v2139_v7 = vor.u32 %v2306_v4, %v2136_v5  ;;  %v2295_v8 = vld [vmem:[%s3784_s5 + $0x194] sm:$0xf]  ;;  %v2300_v12 = vld [vmem:[%s3784_s5 + $0x1b4] sm:$0xf0]  ;;  %v2006_v47 = vld [vmem:[%s3784_s5 + $0xf0] sm:$0xf] }
   0xe   :  { %753 = vmatpush.bf16.msrb.mxu3 %v2131_v63  ;;  %v2091_v11 = vor.u32 %v2295_v8, %v2088_v9  ;;  %v2094_v13 = vld [vmem:[%s3784_s5 + $0x198] sm:$0xf]  ;;  %v2265_v50 = vld [vmem:[%s3784_s5 + $0xa4] sm:$0xf]  ;;  %v1968_v51 = vld [vmem:[%s3784_s5 + $0xc8] sm:$0xf0] }
   0xf   :  { %181 = vmatpush.bf16.msra.mxu1 %v2241_v14  ;;  %v2301_v14 = vld [vmem:[%s3784_s5 + $0x1bc] sm:$0xf0]  ;;  %724 = vmatpush.bf16.msra.mxu2 %v2127_v2  ;;  %v1971_v53 = vor.u32 %v2265_v50, %v1968_v51  ;;  %v2270_v55 = vld [vmem:[%s3784_s5 + $0xc4] sm:$0xf0]  ;;  %v2271_v57 = vld [vmem:[%s3784_s5 + $0xcc] sm:$0xf0] }
  0x10   :  { %782 = vmatpush.bf16.msrb.mxu0 %v2135_v6  ;;  %v1966_v52 = vld [vmem:[%s3784_s5 + $0xa0] sm:$0xf]  ;;  %v1974_v56 = vld [vmem:[%s3784_s5 + $0xa8] sm:$0xf]  ;;  %v2266_v60 = vld [vmem:[%s3784_s5 + $0xac] sm:$0xf] }
  0x11   :  { %v1967_v58 = vor.u32 %v2270_v55, %v1966_v52  ;;  %v1976_v61 = vld [vmem:[%s3784_s5 + $0xd0] sm:$0xf0]  ;;  %v1928_v0 = vld [vmem:[%s3784_s5 + $0x78] sm:$0xf0]  ;;  %v1926_v2 = vld [vmem:[%s3784_s5 + $0x50] sm:$0xf] }
  0x12   :  { %754 = vmatpush.bf16.msrb.mxu3 %v2091_v11  ;;  %v2255_v62 = vld [vmem:[%s3784_s5 + $0x54] sm:$0xf]  ;;  %v1979_v63 = vor.u32 %v2266_v60, %v1976_v61  ;;  %v2260_v3 = vld [vmem:[%s3784_s5 + $0x74] sm:$0xf0]  ;;  %v2261_v6 = vld [vmem:[%s3784_s5 + $0x7c] sm:$0xf0] }
  0x13   :  { %182 = vmatpush.bf16.msra.mxu1 %v2240_v17  ;;  %v2296_v17 = vld [vmem:[%s3784_s5 + $0x19c] sm:$0xf]  ;;  %v1931_v1 = vor.u32 %v2255_v62, %v1928_v0  ;;  %v1934_v4 = vld [vmem:[%s3784_s5 + $0x58] sm:$0xf]  ;;  %v1927_v5 = vor.u32 %v2260_v3, %v1926_v2  ;;  %v1936_v8 = vld [vmem:[%s3784_s5 + $0x80] sm:$0xf0] }
  0x14   :  { %v1935_v9 = vor.u32 %v2261_v6, %v1934_v4  ;;  %v2245_v11 = vld [vmem:[%s3784_s5 + $0x4] sm:$0xf]  ;;  %v2192_v61 = vld [vmem:[%s3784_s5 + $0x270] sm:$0xf0]  ;;  %v2292_v0 = vld [vmem:[%s3784_s5 + $0x174] sm:$0xf0] }
  0x15   :  { %1849 = vmatmul.msk.bf16.gmra.mxu0 %vm56_vm0, %v41_v15  ;;  %v2087_v15 = vor.u32 %v2300_v12, %v2086_v10  ;;  %v1888_v12 = vld [vmem:[%s3784_s5 + $0x28] sm:$0xf0]  ;;  %v2150_v6 = vld [vmem:[%s3784_s5 + $0x1f8] sm:$0xf] }
  0x16   :  { %1851 = vmatmul.msk.bf16.gmra.mxu3 %vm56_vm0, %v43_v16  ;;  %v2095_v16 = vor.u32 %v2301_v14, %v2094_v13  ;;  %v1886_v13 = vld [vmem:[%s3784_s5] sm:$0xf]  ;;  %v1891_v14 = vor.u32 %v2245_v11, %v1888_v12  ;;  %v2024_v4 = vld [vmem:[%s3784_s5 + $0x128] sm:$0xf0] }
  0x17   :  { %183 = vmatpush.bf16.msra.mxu1 %v2239_v18  ;;  %v2096_v18 = vld [vmem:[%s3784_s5 + $0x1c0] sm:$0xf0]  ;;  %725 = vmatpush.bf16.msra.mxu2 %v2087_v15  ;;  %v2250_v15 = vld [vmem:[%s3784_s5 + $0x24] sm:$0xf0]  ;;  %v2022_v11 = vld [vmem:[%s3784_s5 + $0x100] sm:$0xf] }
  0x18   :  { %783 = vmatpush.bf16.msrb.mxu0 %v2095_v16  ;;  %v1894_v16 = vld [vmem:[%s3784_s5 + $0x8] sm:$0xf] }
  0x1b   :  { %184 = vmatpush.bf16.msra.mxu1 %v2238_v19  ;;  %v2285_v19 = vld [vmem:[%s3784_s5 + $0x144] sm:$0xf] }
  0x1f   :  { %185 = vmatpush.bf16.msra.mxu1 %v2237_v20  ;;  %v2099_v20 = vor.u32 %v2296_v17, %v2096_v18  ;;  %v2251_v17 = vld [vmem:[%s3784_s5 + $0x2c] sm:$0xf0]  ;;  %v1887_v18 = vor.u32 %v2250_v15, %v1886_v13  ;;  %v2282_v13 = vld [vmem:[%s3784_s5 + $0x124] sm:$0xf0]  ;;  %v1984_v15 = vld [vmem:[%s3784_s5 + $0xd8] sm:$0xf0] }
  0x23   :  { %810 = vmatpush.bf16.msrb.mxu1 %v2179_v59  ;;  %v1975_v59 = vor.u32 %v2271_v57, %v1974_v56  ;;  %v2190_v57 = vld [vmem:[%s3784_s5 + $0x248] sm:$0xf] }
  0x27   :  { %811 = vmatpush.bf16.msrb.mxu1 %v2139_v7  ;;  %v2256_v7 = vld [vmem:[%s3784_s5 + $0x5c] sm:$0xf] }
  0x28   :  { %v1939_v10 = vor.u32 %v2256_v7, %v1936_v8  ;;  %v2313_v7 = vld [vmem:[%s3784_s5 + $0x21c] sm:$0xf0]  ;;  %v2308_v8 = vld [vmem:[%s3784_s5 + $0x1fc] sm:$0xf] }
  0x2b   :  { %812 = vmatpush.bf16.msrb.mxu1 %v2099_v20  ;;  %v2246_v20 = vld [vmem:[%s3784_s5 + $0xc] sm:$0xf] }
  0x82   :  { %v78_v22 = vpop.f32.mrf.mxu0 }
  0x83   :  { %v79_v23 = vadd.f32 %v2365_v21, %v78_v22  ;;  %v2046_v22 = vld [vmem:[%s3784_s5 + $0x140] sm:$0xf] }
  0x85   :  { %v2490_v24 = vmax.f32 %v79_v23, 0.0  ;;  %v2290_v23 = vld [vmem:[%s3784_s5 + $0x164] sm:$0xf0] }
  0x87   :  { %1828 = vst [vmem:[%s3783_s9] sm:$0xff] %v2490_v24 }
  0x89   :  { %v88_v25 = vpop.f32.mrf.mxu3 }
  0x8a   :  { %v2496_v26 = vadd.f32 %v2365_v21, %v88_v25  ;;  %v80_v27 = vpop.f32.mrf.mxu0  ;;  %v2054_v25 = vld [vmem:[%s3784_s5 + $0x148] sm:$0xf] }
  0x8b   :  { %v81_v28 = vadd.f32 %v2365_v21, %v80_v27  ;;  %v2291_v27 = vld [vmem:[%s3784_s5 + $0x16c] sm:$0xf0] }
  0x8c   :  { %v102_v29 = vmax.f32 %v2496_v26, 0.0  ;;  %v2280_v26 = vld [vmem:[%s3784_s5 + $0x114] sm:$0xf0] }
  0x8d   :  { %v2499_v30 = vmax.f32 %v81_v28, 0.0  ;;  %v2286_v28 = vld [vmem:[%s3784_s5 + $0x14c] sm:$0xf] }
  0x8e   :  { %1832 = vst [vmem:[%s3783_s9 + $0x20] sm:$0xff] %v102_v29 }
  0x8f   :  { %1829 = vst [vmem:[%s3783_s9 + $0x8] sm:$0xff] %v2499_v30  ;;  %v106_v31 = vpack.c.bf16 %v2499_v30, %v2490_v24 }
  0x91   :  { %v90_v32 = vpop.f32.mrf.mxu3  ;;  %186 = vmatmul.bf16.vlgmr.msra.gmra.mxu1 %v106_v31 }
  0x92   :  { %v2512_v33 = vadd.f32 %v2365_v21, %v90_v32  ;;  %v83_v34 = vpop.f32.mrf.mxu0  ;;  %v2056_v32 = vld [vmem:[%s3784_s5 + $0x170] sm:$0xf0] }
  0x93   :  { %v84_v35 = vadd.f32 %v2365_v21, %v83_v34  ;;  %v2047_v34 = vor.u32 %v2290_v23, %v2046_v22  ;;  %v2317_v23 = vld [vmem:[%s3784_s5 + $0x244] sm:$0xf] }
  0x94   :  { %v103_v36 = vmax.f32 %v2512_v33, 0.0  ;;  %v2007_v33 = vor.u32 %v2280_v26, %v2006_v47  ;;  %v2104_v47 = vld [vmem:[%s3784_s5 + $0x1c8] sm:$0xf0] }
  0x95   :  { %v2515_v37 = vmax.f32 %v84_v35, 0.0  ;;  %v2275_v35 = vld [vmem:[%s3784_s5 + $0xf4] sm:$0xf]  ;;  %726 = vmatpush.bf16.msra.mxu2 %v2047_v34 }
  0x96   :  { %1833 = vst [vmem:[%s3783_s9 + $0x28] sm:$0xff] %v103_v36 }
  0x97   :  { %1830 = vst [vmem:[%s3783_s9 + $0x10] sm:$0xff] %v2515_v37 }
  0x99   :  { %v93_v38 = vpop.f32.mrf.mxu3  ;;  %727 = vmatpush.bf16.msra.mxu2 %v2007_v33  ;;  %v2102_v33 = vld [vmem:[%s3784_s5 + $0x1a0] sm:$0xf] }
  0x9a   :  { %v2526_v39 = vadd.f32 %v2365_v21, %v93_v38  ;;  %v85_v40 = vpop.f32.mrf.mxu0  ;;  %v2008_v38 = vld [vmem:[%s3784_s5 + $0x118] sm:$0xf0] }
  0x9b   :  { %v86_v41 = vadd.f32 %v2365_v21, %v85_v40  ;;  %v2055_v40 = vor.u32 %v2291_v27, %v2054_v25  ;;  %v2184_v25 = vld [vmem:[%s3784_s5 + $0x268] sm:$0xf0] }
  0x9c   :  { %v104_v42 = vmax.f32 %v2526_v39, 0.0  ;;  %v2276_v39 = vld [vmem:[%s3784_s5 + $0xfc] sm:$0xf]  ;;  %v2187_v27 = vor.u32 %v2317_v23, %v2184_v25  ;;  %v2112_v23 = vld [vmem:[%s3784_s5 + $0x1d0] sm:$0xf0] }
  0x9d   :  { %v2529_v43 = vmax.f32 %v86_v41, 0.0  ;;  %v2059_v41 = vor.u32 %v2286_v28, %v2056_v32  ;;  %784 = vmatpush.bf16.msrb.mxu0 %v2055_v40  ;;  %728 = vmatpush.bf16.msra.mxu2 %v1967_v58  ;;  %v2182_v28 = vld [vmem:[%s3784_s5 + $0x240] sm:$0xf]  ;;  %v2307_v32 = vld [vmem:[%s3784_s5 + $0x1f4] sm:$0xf] }
  0x9e   :  { %1834 = vst [vmem:[%s3783_s9 + $0x30] sm:$0xff] %v104_v42  ;;  %v2323_v58 = vld [vmem:[%s3784_s5 + $0x26c] sm:$0xf0] }
  0x9f   :  { %1831 = vst [vmem:[%s3783_s9 + $0x18] sm:$0xff] %v2529_v43  ;;  %v107_v44 = vpack.c.bf16 %v2529_v43, %v2515_v37  ;;  %813 = vmatpush.bf16.msrb.mxu1 %v2059_v41  ;;  %v2142_v41 = vld [vmem:[%s3784_s5 + $0x1f0] sm:$0xf]  ;;  %v2191_v60 = vor.u32 %v2323_v58, %v2190_v57 }
  0xa1   :  { %v95_v45 = vpop.f32.mrf.mxu3  ;;  %191 = vmatmul.bf16.gmra.mxu1 %v107_v44  ;;  %v108_v44 = vpack.c.bf16 %v103_v36, %v102_v29  ;;  %v2014_v29 = vld [vmem:[%s3784_s5 + $0xf8] sm:$0xf]  ;;  %v2281_v36 = vld [vmem:[%s3784_s5 + $0x11c] sm:$0xf0]  ;;  %729 = vmatpush.bf16.msra.mxu2 %v1927_v5 }
  0xa2   :  { %v96_v46 = vadd.f32 %v2365_v21, %v95_v45  ;;  %v2048_v21 = vld [vmem:[%s3784_s5 + $0x168] sm:$0xf0]  ;;  %v2011_v45 = vor.u32 %v2275_v35, %v2008_v38  ;;  %v2015_v48 = vor.u32 %v2281_v36, %v2014_v29  ;;  %v2144_v35 = vld [vmem:[%s3784_s5 + $0x218] sm:$0xf0]  ;;  %v2780_v29 = vld [vmem:[%s3782_s4] ss:$0 sm:$0xff] }
  0xa3   :  { %v2051_v31 = vor.u32 %v2285_v19, %v2048_v21  ;;  %v1895_v19 = vor.u32 %v2251_v17, %v1894_v16  ;;  %v1896_v21 = vld [vmem:[%s3784_s5 + $0x30] sm:$0xf0]  ;;  %v2147_v38 = vor.u32 %v2307_v32, %v2144_v35  ;;  %v2302_v36 = vld [vmem:[%s3784_s5 + $0x1c4] sm:$0xf0]  ;;  %v2023_v16 = vor.u32 %v2282_v13, %v2022_v11  ;;  %v2293_v32 = vld [vmem:[%s3784_s5 + $0x17c] sm:$0xf0] }
  0xa4   :  { %v2560_v54 = vmax.f32 %v96_v46, 0.0  ;;  %785 = vmatpush.bf16.msrb.mxu0 %v2015_v48  ;;  %v1899_v22 = vor.u32 %v2246_v20, %v1896_v21  ;;  %v2064_v48 = vld [vmem:[%s3784_s5 + $0x178] sm:$0xf0]  ;;  %v2298_v20 = vld [vmem:[%s3784_s5 + $0x1ac] sm:$0xf] }
  0xa5   :  { %755 = vmatpush.bf16.msrb.mxu3 %v2051_v31  ;;  %730 = vmatpush.bf16.msra.mxu2 %v1887_v18  ;;  %v2322_v31 = vld [vmem:[%s3784_s5 + $0x264] sm:$0xf0]  ;;  %v2252_v11 = vld [vmem:[%s3784_s5 + $0x34] sm:$0xf0]  ;;  %v2253_v13 = vld [vmem:[%s3784_s5 + $0x3c] sm:$0xf0] }
  0xa6   :  { %1835 = vst [vmem:[%s3783_s9 + $0x38] sm:$0xff] %v2560_v54  ;;  %v109_v46 = vpack.c.bf16 %v2560_v54, %v104_v42  ;;  %v2016_v42 = vld [vmem:[%s3784_s5 + $0x120] sm:$0xf0]  ;;  %v2183_v34 = vor.u32 %v2322_v31, %v2182_v28  ;;  %v2110_v18 = vld [vmem:[%s3784_s5 + $0x1a8] sm:$0xf] }
  0xa7   :  { %v2019_v49 = vor.u32 %v2276_v39, %v2016_v42  ;;  %v2103_v39 = vor.u32 %v2302_v36, %v2102_v33  ;;  %v2287_v42 = vld [vmem:[%s3784_s5 + $0x154] sm:$0xf]  ;;  %v2070_v31 = vld [vmem:[%s3784_s5 + $0x158] sm:$0xf] }
  0xa8   :  { %786 = vmatpush.bf16.msrb.mxu0 %v1975_v59  ;;  %v2318_v59 = vld [vmem:[%s3784_s5 + $0x24c] sm:$0xf]  ;;  %v2032_v36 = vld [vmem:[%s3784_s5 + $0x130] sm:$0xf0] }
  0xa9   :  { %756 = vmatpush.bf16.msrb.mxu3 %v2011_v45  ;;  %814 = vmatpush.bf16.msrb.mxu1 %v2019_v49  ;;  %v2297_v45 = vld [vmem:[%s3784_s5 + $0x1a4] sm:$0xf]  ;;  %v2067_v49 = vor.u32 %v2287_v42, %v2064_v48  ;;  %v2195_v2 = vor.u32 %v2318_v59, %v2192_v61  ;;  %v1982_v42 = vld [vmem:[%s3784_s5 + $0xb0] sm:$0xf]  ;;  %v2272_v48 = vld [vmem:[%s3784_s5 + $0xd4] sm:$0xf0] }
  0xaa   :  { %839 = vmatpush.bf16.msrb.mxu2 %v2183_v34  ;;  %v2107_v26 = vor.u32 %v2297_v45, %v2104_v47  ;;  %v2288_v34 = vld [vmem:[%s3784_s5 + $0x15c] sm:$0xf]  ;;  %v2283_v47 = vld [vmem:[%s3784_s5 + $0x12c] sm:$0xf0]  ;;  %v1942_v61 = vld [vmem:[%s3784_s5 + $0x60] sm:$0xf] }
  0xab   :  { %v2268_v59 = vld [vmem:[%s3784_s5 + $0xbc] sm:$0xf] }
  0xac   :  { %787 = vmatpush.bf16.msrb.mxu0 %v1935_v9  ;;  %v2151_v9 = vor.u32 %v2313_v7, %v2150_v6  ;;  %v2258_v7 = vld [vmem:[%s3784_s5 + $0x6c] sm:$0xf] }
  0xad   :  { %757 = vmatpush.bf16.msrb.mxu3 %v1971_v53  ;;  %815 = vmatpush.bf16.msrb.mxu1 %v1979_v63  ;;  %v2062_v63 = vld [vmem:[%s3784_s5 + $0x150] sm:$0xf] }
  0xae   :  { %v2063_v3 = vor.u32 %v2292_v0, %v2062_v63  ;;  %v2262_v63 = vld [vmem:[%s3784_s5 + $0x84] sm:$0xf0]  ;;  %v2247_v0 = vld [vmem:[%s3784_s5 + $0x14] sm:$0xf] }
  0xb0   :  { %788 = vmatpush.bf16.msrb.mxu0 %v1895_v19  ;;  %v2303_v19 = vld [vmem:[%s3784_s5 + $0x1cc] sm:$0xf0] }
  0xb1   :  { %196 = vmatmul.bf16.gmra.mxu1 %v108_v44  ;;  %758 = vmatpush.bf16.msrb.mxu3 %v1931_v1  ;;  %v2312_v44 = vld [vmem:[%s3784_s5 + $0x214] sm:$0xf0]  ;;  %v2277_v1 = vld [vmem:[%s3784_s5 + $0x104] sm:$0xf] }
  0xb2   :  { %816 = vmatpush.bf16.msrb.mxu1 %v1939_v10  ;;  %v2027_v5 = vor.u32 %v2277_v1, %v2024_v4  ;;  %v2152_v10 = vld [vmem:[%s3784_s5 + $0x220] sm:$0xf0]  ;;  %v1943_v1 = vor.u32 %v2262_v63, %v1942_v61  ;;  %v2263_v4 = vld [vmem:[%s3784_s5 + $0x8c] sm:$0xf0] }
  0xb3   :  { %v2155_v12 = vor.u32 %v2308_v8, %v2152_v10  ;;  %v1952_v8 = vld [vmem:[%s3784_s5 + $0x90] sm:$0xf0] }
  0xb4   :  { %897 = vmatpush.bf16.msra.mxu0 %v2191_v60  ;;  %v1992_v60 = vld [vmem:[%s3784_s5 + $0xe0] sm:$0xf0]  ;;  %v1955_v10 = vor.u32 %v2258_v7, %v1952_v8  ;;  %v2274_v7 = vld [vmem:[%s3784_s5 + $0xe4] sm:$0xf0]  ;;  %v2331_v8 = vld [vmem:[%s3785_s7 + $0x30] sm:$0xff] }
  0xb5   :  { %759 = vmatpush.bf16.msrb.mxu3 %v1891_v14  ;;  %v2267_v14 = vld [vmem:[%s3784_s5 + $0xb4] sm:$0xf] }
  0xb6   :  { %817 = vmatpush.bf16.msrb.mxu1 %v1899_v22  ;;  %v1987_v17 = vor.u32 %v2267_v14, %v1984_v15  ;;  %v2111_v22 = vor.u32 %v2303_v19, %v2110_v18 }
  0xb8   :  { %898 = vmatpush.bf16.msra.mxu0 %v2151_v9  ;;  %v1902_v9 = vld [vmem:[%s3784_s5 + $0x10] sm:$0xf] }
  0xb9   :  { %868 = vmatpush.bf16.msra.mxu3 %v2187_v27  ;;  %v2115_v27 = vor.u32 %v2298_v20, %v2112_v23  ;;  %v1903_v15 = vor.u32 %v2252_v11, %v1902_v9  ;;  %v2000_v11 = vld [vmem:[%s3784_s5 + $0xe8] sm:$0xf0] }
  0xba   :  { %926 = vmatpush.bf16.msra.mxu1 %v2195_v2  ;;  %v1904_v2 = vld [vmem:[%s3784_s5 + $0x38] sm:$0xf0] }
  0xbc   :  { %899 = vmatpush.bf16.msra.mxu0 %v2111_v22 }
  0xbd   :  { %869 = vmatpush.bf16.msra.mxu3 %v2147_v38 }
  0xbe   :  { %927 = vmatpush.bf16.msra.mxu1 %v2155_v12  ;;  %v1910_v12 = vld [vmem:[%s3784_s5 + $0x18] sm:$0xf] }
  0xbf   :  { %v1911_v20 = vor.u32 %v2253_v13, %v1910_v12  ;;  %v2330_v12 = vld [vmem:[%s3785_s7 + $0x28] sm:$0xff] }
  0xc1   :  { %201 = vmatmul.bf16.gmra.mxu1 %v109_v46  ;;  %v2143_v46 = vor.u32 %v2312_v44, %v2142_v41  ;;  %870 = vmatpush.bf16.msra.mxu3 %v2107_v26  ;;  %v2072_v41 = vld [vmem:[%s3784_s5 + $0x180] sm:$0xf0]  ;;  %v2278_v26 = vld [vmem:[%s3784_s5 + $0x10c] sm:$0xf] }
  0xc2   :  { %928 = vmatpush.bf16.msra.mxu1 %v2115_v27  ;;  %v2075_v44 = vor.u32 %v2288_v34, %v2072_v41 }
  0xc3   :  { %840 = vmatpush.bf16.msrb.mxu2 %v2143_v46  ;;  %v2030_v46 = vld [vmem:[%s3784_s5 + $0x108] sm:$0xf] }
  0xc4   :  { %v2031_v33 = vor.u32 %v2283_v47, %v2030_v46  ;;  %v2158_v46 = vld [vmem:[%s3784_s5 + $0x200] sm:$0xf]  ;;  %v2118_v47 = vld [vmem:[%s3784_s5 + $0x1b0] sm:$0xf] }
  0xc5   :  { %871 = vmatpush.bf16.msra.mxu3 %v2067_v49  ;;  %v2257_v49 = vld [vmem:[%s3784_s5 + $0x64] sm:$0xf] }
  0xc6   :  { %929 = vmatpush.bf16.msra.mxu1 %v2075_v44 }
  0xc7   :  { %841 = vmatpush.bf16.msrb.mxu2 %v2103_v39 }
  0xc9   :  { %872 = vmatpush.bf16.msra.mxu3 %v2027_v5  ;;  %v1907_v5 = vor.u32 %v2247_v0, %v1904_v2  ;;  %v2289_v0 = vld [vmem:[%s3784_s5 + $0x164] sm:$0xf] }
  0xcb   :  { %842 = vmatpush.bf16.msrb.mxu2 %v2063_v3  ;;  %v1950_v3 = vld [vmem:[%s3784_s5 + $0x68] sm:$0xf] }
  0xcc   :  { %v1951_v6 = vor.u32 %v2263_v4, %v1950_v3  ;;  %v2279_v3 = vld [vmem:[%s3784_s5 + $0x114] sm:$0xf]  ;;  %v2040_v4 = vld [vmem:[%s3784_s5 + $0x138] sm:$0xf0] }
  0xcd   :  { %873 = vmatpush.bf16.msra.mxu3 %v1987_v17  ;;  %v1912_v17 = vld [vmem:[%s3784_s5 + $0x40] sm:$0xf0] }
  0xcf   :  { %843 = vmatpush.bf16.msrb.mxu2 %v2023_v16  ;;  %v2248_v16 = vld [vmem:[%s3784_s5 + $0x1c] sm:$0xf] }
 0x10e   :  { %v187_v40 = vpop.f32.mrf.mxu1 }
 0x10f   :  { %v188_v50 = vadd.f32 %v2780_v29, %v187_v40  ;;  %v2071_v40 = vor.u32 %v2293_v32, %v2070_v31  ;;  %v2324_v31 = vld [vmem:[%s3784_s5 + $0x274] sm:$0xf0] }
 0x111   :  { %v207_v53 = vmax.f32 %v188_v50, 0.0  ;;  %900 = vmatpush.bf16.msra.mxu0 %v2071_v40  ;;  %v2035_v50 = vor.u32 %v2278_v26, %v2032_v36 }
 0x113   :  { %930 = vmatpush.bf16.msra.mxu1 %v2035_v50  ;;  %v2294_v50 = vld [vmem:[%s3784_s5 + $0x184] sm:$0xf0] }
 0x115   :  { %901 = vmatpush.bf16.msra.mxu0 %v2031_v33  ;;  %v2304_v33 = vld [vmem:[%s3784_s5 + $0x1d4] sm:$0xf0] }
 0x116   :  { %v189_v51 = vpop.f32.mrf.mxu1  ;;  %v2119_v36 = vor.u32 %v2304_v33, %v2118_v47 }
 0x117   :  { %v190_v52 = vadd.f32 %v2780_v29, %v189_v51  ;;  %v1983_v51 = vor.u32 %v2272_v48, %v1982_v42  ;;  %v2200_v42 = vld [vmem:[%s3784_s5 + $0x278] sm:$0xf0] }
 0x119   :  { %v208_v55 = vmax.f32 %v190_v52, 0.0  ;;  %v1944_v52 = vld [vmem:[%s3784_s5 + $0x88] sm:$0xf0]  ;;  %844 = vmatpush.bf16.msrb.mxu2 %v1983_v51  ;;  %v2309_v51 = vld [vmem:[%s3784_s5 + $0x204] sm:$0xf] }
 0x11a   :  { %v1947_v57 = vor.u32 %v2257_v49, %v1944_v52  ;;  %v2078_v49 = vld [vmem:[%s3784_s5 + $0x160] sm:$0xf] }
 0x11b   :  { %v2796_v56 = vpack.c.bf16 %v208_v55, %v207_v53  ;;  %v1990_v53 = vld [vmem:[%s3784_s5 + $0xb8] sm:$0xf]  ;;  %v2273_v55 = vld [vmem:[%s3784_s5 + $0xdc] sm:$0xf0]  ;;  %v2079_v52 = vor.u32 %v2294_v50, %v2078_v49 }
 0x11c   :  { %v1991_v58 = vor.u32 %v2273_v55, %v1990_v53  ;;  %874 = vmatpush.bf16.msra.mxu3 %v1947_v57  ;;  %v2160_v53 = vld [vmem:[%s3784_s5 + $0x228] sm:$0xf0]  ;;  %v2038_v55 = vld [vmem:[%s3784_s5 + $0x110] sm:$0xf]  ;;  %v2284_v57 = vld [vmem:[%s3784_s5 + $0x134] sm:$0xf0] }
 0x11d   :  { %731 = vmatmul.bf16.vlgmr.msra.gmra.mxu2 %v2796_v56  ;;  %760 = vmatmul.bf16.vlgmr.msrb.gmra.mxu3 %v2796_v56  ;;  %v2039_v61 = vor.u32 %v2284_v57, %v2038_v55 }
 0x11e   :  { %789 = vmatmul.bf16.vlgmr.msrb.gmra.mxu0 %v2796_v56  ;;  %818 = vmatmul.bf16.vlgmr.msrb.gmra.mxu1 %v2796_v56  ;;  %v192_v62 = vpop.f32.mrf.mxu1 }
 0x11f   :  { %v193_v21 = vadd.f32 %v2780_v29, %v192_v62  ;;  %v1995_v62 = vor.u32 %v2268_v59, %v1992_v60  ;;  %902 = vmatpush.bf16.msra.mxu0 %v1991_v58  ;;  %845 = vmatpush.bf16.msrb.mxu2 %v1943_v1  ;;  %v2163_v58 = vor.u32 %v2309_v51, %v2160_v53  ;;  %v2299_v59 = vld [vmem:[%s3784_s5 + $0x1b4] sm:$0xf]  ;;  %v2120_v60 = vld [vmem:[%s3784_s5 + $0x1d8] sm:$0xf0]  ;;  %v2080_v1 = vld [vmem:[%s3784_s5 + $0x188] sm:$0xf0] }
 0x120   :  { %875 = vmatpush.bf16.msra.mxu3 %v1907_v5  ;;  %v2123_v63 = vor.u32 %v2299_v59, %v2120_v60  ;;  %v2083_v2 = vor.u32 %v2289_v0, %v2080_v1  ;;  %v2043_v5 = vor.u32 %v2279_v3, %v2040_v4 }
 0x121   :  { %v209_v35 = vmax.f32 %v193_v21, 0.0  ;;  %931 = vmatpush.bf16.msra.mxu1 %v1995_v62  ;;  %v1915_v21 = vor.u32 %v2248_v16, %v1912_v17  ;;  %v2332_v62 = vld [vmem:[%s3785_s7 + $0x38] sm:$0xff]  ;;  %v2259_v16 = vld [vmem:[%s3784_s5 + $0x74] sm:$0xf] }
 0x123   :  { %903 = vmatpush.bf16.msra.mxu0 %v1951_v6  ;;  %846 = vmatpush.bf16.msrb.mxu2 %v1903_v15  ;;  %v1998_v6 = vld [vmem:[%s3784_s5 + $0xc0] sm:$0xf]  ;;  %v2264_v15 = vld [vmem:[%s3784_s5 + $0x94] sm:$0xf0] }
 0x124   :  { %v1999_v9 = vor.u32 %v2274_v7, %v1998_v6 }
 0x125   :  { %932 = vmatpush.bf16.msra.mxu1 %v1955_v10  ;;  %v2269_v10 = vld [vmem:[%s3784_s5 + $0xc4] sm:$0xf] }
 0x126   :  { %v194_v25 = vpop.f32.mrf.mxu1  ;;  %v2003_v13 = vor.u32 %v2269_v10, %v2000_v11 }
 0x127   :  { %v195_v28 = vadd.f32 %v2780_v29, %v194_v25  ;;  %904 = vmatpush.bf16.msra.mxu0 %v1911_v20  ;;  %v2329_v20 = vld [vmem:[%s3785_s7 + $0x20] sm:$0xff] }
 0x129   :  { %v210_v38 = vmax.f32 %v195_v28, 0.0  ;;  %933 = vmatpush.bf16.msra.mxu1 %v1915_v21  ;;  %v2198_v28 = vld [vmem:[%s3784_s5 + $0x250] sm:$0xf]  ;;  %v1918_v21 = vld [vmem:[%s3784_s5 + $0x20] sm:$0xf] }
 0x12a   :  { %v2199_v32 = vor.u32 %v2324_v31, %v2198_v28  ;;  %v1920_v28 = vld [vmem:[%s3784_s5 + $0x48] sm:$0xf0] }
 0x12b   :  { %v2876_v45 = vpack.c.bf16 %v210_v38, %v209_v35  ;;  %1277 = vmatpush.bf16.msrb.mxu0 %v2332_v62 }
 0x12c   :  { %955 = vmatpush.bf16.msra.mxu2 %v2199_v32  ;;  %v2328_v32 = vld [vmem:[%s3785_s7 + $0x18] sm:$0xff] }
 0x12d   :  { %736 = vmatmul.bf16.gmra.mxu2 %v2876_v45  ;;  %765 = vmatmul.bf16.gmra.mxu3 %v2876_v45 }
 0x12e   :  { %794 = vmatmul.bf16.gmra.mxu0 %v2876_v45  ;;  %823 = vmatmul.bf16.gmra.mxu1 %v2876_v45  ;;  %v197_v39 = vpop.f32.mrf.mxu1 }
 0x12f   :  { %v198_v14 = vadd.f32 %v2780_v29, %v197_v39  ;;  %v2319_v39 = vld [vmem:[%s3784_s5 + $0x254] sm:$0xf]  ;;  %2334 = vmatpush.bf16.msrb.mxu1 %v2332_v62  ;;  %1278 = vmatpush.bf16.msrb.mxu0 %v2331_v8 }
 0x130   :  { %v2203_v48 = vor.u32 %v2319_v39, %v2200_v42 }
 0x131   :  { %v211_v22 = vmax.f32 %v198_v14, 0.0  ;;  %v1958_v14 = vld [vmem:[%s3784_s5 + $0x70] sm:$0xf] }
 0x132   :  { %984 = vmatpush.bf16.msrb.mxu3 %v2203_v48  ;;  %v1959_v17 = vor.u32 %v2264_v15, %v1958_v14 }
 0x133   :  { %2337 = vmatpush.bf16.msrb.mxu1 %v2331_v8  ;;  %1279 = vmatpush.bf16.msrb.mxu0 %v2330_v12 }
 0x136   :  { %v199_v18 = vpop.f32.mrf.mxu1  ;;  %985 = vmatpush.bf16.msrb.mxu3 %v2163_v58 }
 0x137   :  { %v200_v19 = vadd.f32 %v2780_v29, %v199_v18  ;;  %v1960_v18 = vld [vmem:[%s3784_s5 + $0x98] sm:$0xf0]  ;;  %2340 = vmatpush.bf16.msrb.mxu1 %v2330_v12  ;;  %1280 = vmatpush.bf16.msrb.mxu0 %v2329_v20 }
 0x139   :  { %v212_v23 = vmax.f32 %v200_v19, 0.0  ;;  %v1963_v19 = vor.u32 %v2259_v16, %v1960_v18 }
 0x13a   :  { %986 = vmatpush.bf16.msrb.mxu3 %v2123_v63 }
 0x13b   :  { %v2962_v25 = vpack.c.bf16 %v212_v23, %v211_v22  ;;  %2343 = vmatpush.bf16.msrb.mxu1 %v2329_v20  ;;  %v2254_v22 = vld [vmem:[%s3784_s5 + $0x44] sm:$0xf0]  ;;  %v2249_v23 = vld [vmem:[%s3784_s5 + $0x24] sm:$0xf]  ;;  %1281 = vmatpush.bf16.msrb.mxu0 %v2328_v32 }
 0x13c   :  { %v1923_v31 = vor.u32 %v2249_v23, %v1920_v28 }
 0x13d   :  { %741 = vmatmul.bf16.gmra.mxu2 %v2962_v25  ;;  %770 = vmatmul.bf16.gmra.mxu3 %v2962_v25 }
 0x13e   :  { %799 = vmatmul.bf16.gmra.mxu0 %v2962_v25  ;;  %828 = vmatmul.bf16.gmra.mxu1 %v2962_v25  ;;  %v202_v27 = vpop.f32.mrf.mxu1 }
 0x13f   :  { %v203_v34 = vadd.f32 %v2780_v29, %v202_v27  ;;  %987 = vmatpush.bf16.msrb.mxu3 %v2083_v2  ;;  %v1919_v27 = vor.u32 %v2254_v22, %v1918_v21  ;;  %2346 = vmatpush.bf16.msrb.mxu1 %v2328_v32 }
 0x141   :  { %v213_v40 = vmax.f32 %v203_v34, 0.0  ;;  %v2327_v34 = vld [vmem:[%s3785_s7 + $0x10] sm:$0xff] }
 0x142   :  { %1282 = vmatpush.bf16.msrb.mxu0 %v2327_v34 }
 0x143   :  { %988 = vmatpush.bf16.msrb.mxu3 %v2043_v5  ;;  %2349 = vmatpush.bf16.msrb.mxu1 %v2327_v34 }
 0x146   :  { %v204_v35 = vpop.f32.mrf.mxu1 }
 0x147   :  { %v205_v38 = vadd.f32 %v2780_v29, %v204_v35  ;;  %v2314_v29 = vld [vmem:[%s3784_s5 + $0x224] sm:$0xf0]  ;;  %989 = vmatpush.bf16.msrb.mxu3 %v2003_v13  ;;  %s2381_s5 = smov 112  }
 0x148   :  { %v2159_v26 = vor.u32 %v2314_v29, %v2158_v46  ;;  %v2326_v35 = vld [vmem:[%s3785_s7 + $0x8] sm:$0xff] }
 0x149   :  { %v214_v41 = vmax.f32 %v205_v38, 0.0  ;;  %2352 = vmatpush.bf16.msrb.mxu1 %v2326_v35  ;;  %v2325_v38 = vld [vmem:[%s3785_s7] sm:$0xff]  ;;  %1283 = vmatpush.bf16.msrb.mxu0 %v2326_v35 }
 0x14a   :  { %956 = vmatpush.bf16.msra.mxu2 %v2159_v26 }
 0x14b   :  { %v2976_v44 = vpack.c.bf16 %v214_v41, %v213_v40  ;;  %990 = vmatpush.bf16.msrb.mxu3 %v1963_v19  ;;  %v3115_v40 = vld [vmem:[%s3786_s6] sm:$0xff] }
 0x14c   :  { %v3120_v29 = vperm.slane %v3115_v40, 3 }
 0x14d   :  { %746 = vmatmul.bf16.gmra.mxu2 %v2976_v44  ;;  %775 = vmatmul.bf16.gmra.mxu3 %v2976_v44 }
 0x14e   :  { %804 = vmatmul.bf16.gmra.mxu0 %v2976_v44  ;;  %833 = vmatmul.bf16.gmra.mxu1 %v2976_v44 }
 0x14f   :  { %957 = vmatpush.bf16.msra.mxu2 %v2119_v36  ;;  %991 = vmatpush.bf16.msrb.mxu3 %v1923_v31  ;;  %v3128_v36 = vperm.slane %v3115_v40, 0 }
 0x150   :  { %2355 = vmatpush.bf16.msrb.mxu1 %v2325_v38  ;;  %1284 = vmatpush.bf16.msrb.mxu0 %v2325_v38 }
 0x153   :  { %958 = vmatpush.bf16.msra.mxu2 %v2079_v52 }
 0x157   :  { %959 = vmatpush.bf16.msra.mxu2 %v2039_v61 }
 0x15b   :  { %960 = vmatpush.bf16.msra.mxu2 %v1999_v9 }
 0x15d   :  { %847 = vmatmul.bf16.vlgmr.msrb.gmra.mxu2 %v2796_v56  ;;  %876 = vmatmul.bf16.vlgmr.msra.gmra.mxu3 %v2796_v56 }
 0x15e   :  { %905 = vmatmul.bf16.vlgmr.msra.gmra.mxu0 %v2796_v56  ;;  %934 = vmatmul.bf16.vlgmr.msra.gmra.mxu1 %v2796_v56 }
 0x15f   :  { %961 = vmatpush.bf16.msra.mxu2 %v1959_v17  ;;  %2336 = vmatpush.bf16.msra.mxu3 %v2332_v62 }
 0x163   :  { %962 = vmatpush.bf16.msra.mxu2 %v1919_v27  ;;  %2339 = vmatpush.bf16.msra.mxu3 %v2331_v8 }
 0x167   :  { %2335 = vmatpush.bf16.msrb.mxu2 %v2332_v62  ;;  %2342 = vmatpush.bf16.msra.mxu3 %v2330_v12 }
 0x16b   :  { %2338 = vmatpush.bf16.msrb.mxu2 %v2331_v8  ;;  %2345 = vmatpush.bf16.msra.mxu3 %v2329_v20 }
 0x16d   :  { %852 = vmatmul.bf16.gmra.mxu2 %v2876_v45  ;;  %881 = vmatmul.bf16.gmra.mxu3 %v2876_v45 }
 0x16e   :  { %910 = vmatmul.bf16.gmra.mxu0 %v2876_v45  ;;  %939 = vmatmul.bf16.gmra.mxu1 %v2876_v45 }
 0x16f   :  { %2341 = vmatpush.bf16.msrb.mxu2 %v2330_v12  ;;  %2348 = vmatpush.bf16.msra.mxu3 %v2328_v32 }
 0x173   :  { %2344 = vmatpush.bf16.msrb.mxu2 %v2329_v20  ;;  %2351 = vmatpush.bf16.msra.mxu3 %v2327_v34 }
 0x177   :  { %2347 = vmatpush.bf16.msrb.mxu2 %v2328_v32  ;;  %2354 = vmatpush.bf16.msra.mxu3 %v2326_v35 }
 0x17b   :  { %2350 = vmatpush.bf16.msrb.mxu2 %v2327_v34  ;;  %2357 = vmatpush.bf16.msra.mxu3 %v2325_v38 }
 0x17d   :  { %857 = vmatmul.bf16.gmra.mxu2 %v2962_v25  ;;  %886 = vmatmul.bf16.gmra.mxu3 %v2962_v25 }
 0x17e   :  { %915 = vmatmul.bf16.gmra.mxu0 %v2962_v25  ;;  %944 = vmatmul.bf16.gmra.mxu1 %v2962_v25 }
 0x17f   :  { %2353 = vmatpush.bf16.msrb.mxu2 %v2326_v35  ;;  %v3179_v35 = vld [vmem:[%s3783_s9 + $0x28] sm:$0xff] }
 0x183   :  { %2356 = vmatpush.bf16.msrb.mxu2 %v2325_v38 }
 0x18d   :  { %862 = vmatmul.bf16.gmra.mxu2 %v2976_v44  ;;  %891 = vmatmul.bf16.gmra.mxu3 %v2976_v44 }
 0x18e   :  { %920 = vmatmul.bf16.gmra.mxu0 %v2976_v44  ;;  %949 = vmatmul.bf16.gmra.mxu1 %v2976_v44 }
 0x19b   :  { %v3117_v41 = vpop.f32.mrf.mxu0  ;;  %v819_v46 = vpop.f32.mrf.mxu1 }
 0x19c   :  { %v820_v47 = vadd.f32 %v819_v46, %v3120_v29 }
 0x19d   :  { %963 = vmatmul.bf16.vlgmr.msra.gmra.mxu2 %v2796_v56  ;;  %992 = vmatmul.bf16.vlgmr.msrb.gmra.mxu3 %v2796_v56 }
 0x19e   :  { %v1016_v48 = vmax.f32 %v820_v47, 0.0 }
 0x1a0   :  { %v732_v26 = vpop.f32.mrf.mxu2  ;;  %v3125_v33 = vpop.f32.mrf.mxu3  ;;  %v1117_v52 = vmul.f32 %v1016_v48, %v2490_v24 }
 0x1a1   :  { %v733_v50 = vadd.f32 %v732_v26, %v3128_v36 }
 0x1a3   :  { %v3130_v39 = vpop.f32.mrf.mxu0  ;;  %v821_v42 = vpop.f32.mrf.mxu1  ;;  %v1013_v57 = vmax.f32 %v733_v50, 0.0 }
 0x1a4   :  { %v822_v49 = vadd.f32 %v821_v42, %v3120_v29 }
 0x1a5   :  { %v1093_v63 = vmul.f32 %v1013_v57, %v2490_v24 }
 0x1a6   :  { %v1026_v51 = vmax.f32 %v822_v49, 0.0 }
 0x1a8   :  { %v1118_v56 = vmul.f32 %v1026_v51, %v2499_v30  ;;  %v734_v53 = vpop.f32.mrf.mxu2  ;;  %v3136_v55 = vpop.f32.mrf.mxu3 }
 0x1a9   :  { %v735_v58 = vadd.f32 %v734_v53, %v3128_v36 }
 0x1aa   :  { %v1185_v59 = vpack.c.bf16 %v1118_v56, %v1117_v52 }
 0x1ab   :  { %v1023_v60 = vmax.f32 %v735_v58, 0.0  ;;  %v3139_v61 = vpop.f32.mrf.mxu0  ;;  %v824_v62 = vpop.f32.mrf.mxu1 }
 0x1ac   :  { %1345 = vmatmul.bf16.vlgmr.msrb.gmra.mxu1 %v1185_v59  ;;  %v825_v2 = vadd.f32 %v824_v62, %v3120_v29 }
 0x1ad   :  { %v1094_v0 = vmul.f32 %v1023_v60, %v2499_v30  ;;  %968 = vmatmul.bf16.gmra.mxu2 %v2876_v45  ;;  %997 = vmatmul.bf16.gmra.mxu3 %v2876_v45 }
 0x1ae   :  { %v1036_v7 = vmax.f32 %v825_v2, 0.0 }
 0x1af   :  { %v1173_v1 = vpack.c.bf16 %v1094_v0, %v1093_v63 }
 0x1b0   :  { %v737_v3 = vpop.f32.mrf.mxu2  ;;  %v3146_v4 = vpop.f32.mrf.mxu3  ;;  %v1119_v9 = vmul.f32 %v1036_v7, %v2515_v37 }
 0x1b1   :  { %1285 = vmatmul.bf16.vlgmr.msrb.gmra.mxu0 %v1173_v1  ;;  %v738_v24 = vadd.f32 %v737_v3, %v3128_v36 }
 0x1b3   :  { %v3148_v5 = vpop.f32.mrf.mxu0  ;;  %v826_v6 = vpop.f32.mrf.mxu1  ;;  %v1033_v12 = vmax.f32 %v738_v24, 0.0 }
 0x1b4   :  { %v827_v8 = vadd.f32 %v826_v6, %v3120_v29 }
 0x1b5   :  { %v1095_v18 = vmul.f32 %v1033_v12, %v2515_v37  ;;  %v3214_v12 = vld [vmem:[%s3783_s9 + $0x38] sm:$0xff] }
 0x1b6   :  { %v1046_v30 = vmax.f32 %v827_v8, 0.0 }
 0x1b8   :  { %v1120_v45 = vmul.f32 %v1046_v30, %v2529_v43  ;;  %v739_v10 = vpop.f32.mrf.mxu2  ;;  %v3154_v11 = vpop.f32.mrf.mxu3 }
 0x1b9   :  { %v740_v13 = vadd.f32 %v739_v10, %v3128_v36 }
 0x1ba   :  { %v1186_v14 = vpack.c.bf16 %v1120_v45, %v1119_v9 }
 0x1bb   :  { %v1043_v15 = vmax.f32 %v740_v13, 0.0  ;;  %v3157_v16 = vpop.f32.mrf.mxu0  ;;  %v829_v17 = vpop.f32.mrf.mxu1 }
 0x1bc   :  { %1350 = vmatmul.bf16.gmra.mxu1 %v1186_v14  ;;  %v830_v21 = vadd.f32 %v829_v17, %v3120_v29 }
 0x1bd   :  { %973 = vmatmul.bf16.gmra.mxu2 %v2962_v25  ;;  %1002 = vmatmul.bf16.gmra.mxu3 %v2962_v25  ;;  %v1096_v19 = vmul.f32 %v1043_v15, %v2529_v43  ;;  %v3173_v43 = vld [vmem:[%s3783_s9 + $0x20] sm:$0xff] }
 0x1be   :  { %v1056_v31 = vmax.f32 %v830_v21, 0.0 }
 0x1bf   :  { %v1174_v20 = vpack.c.bf16 %v1096_v19, %v1095_v18  ;;  %v3225_v18 = vperm.slane %v3115_v40, 4 }
 0x1c0   :  { %v742_v22 = vpop.f32.mrf.mxu2  ;;  %v3164_v23 = vpop.f32.mrf.mxu3  ;;  %v1121_v25 = vmul.f32 %v3173_v43, %v1056_v31 }
 0x1c1   :  { %1290 = vmatmul.bf16.gmra.mxu0 %v1174_v20  ;;  %v743_v37 = vadd.f32 %v742_v22, %v3128_v36 }
 0x1c3   :  { %v3166_v27 = vpop.f32.mrf.mxu0  ;;  %v831_v28 = vpop.f32.mrf.mxu1  ;;  %v1053_v26 = vmax.f32 %v743_v37, 0.0 }
 0x1c4   :  { %v832_v32 = vadd.f32 %v831_v28, %v3120_v29 }
 0x1c5   :  { %v1097_v52 = vmul.f32 %v3173_v43, %v1053_v26 }
 0x1c6   :  { %v1066_v34 = vmax.f32 %v832_v32, 0.0 }
 0x1c8   :  { %v1122_v38 = vmul.f32 %v3179_v35, %v1066_v34  ;;  %v744_v46 = vpop.f32.mrf.mxu2  ;;  %v3182_v47 = vpop.f32.mrf.mxu3 }
 0x1c9   :  { %v745_v42 = vadd.f32 %v744_v46, %v3128_v36 }
 0x1ca   :  { %v1187_v48 = vpack.c.bf16 %v1122_v38, %v1121_v25 }
 0x1cb   :  { %v1063_v49 = vmax.f32 %v745_v42, 0.0  ;;  %v3185_v50 = vpop.f32.mrf.mxu0  ;;  %v834_v51 = vpop.f32.mrf.mxu1  ;;  %v3250_v42 = vld [vmem:[%s3783_s9] sm:$0xff] }
 0x1cc   :  { %1355 = vmatmul.bf16.gmra.mxu1 %v1187_v48  ;;  %v835_v57 = vadd.f32 %v834_v51, %v3120_v29 }
 0x1cd   :  { %v1098_v56 = vmul.f32 %v3179_v35, %v1063_v49  ;;  %978 = vmatmul.bf16.gmra.mxu2 %v2976_v44  ;;  %1007 = vmatmul.bf16.gmra.mxu3 %v2976_v44  ;;  %v3201_v44 = vld [vmem:[%s3783_s9 + $0x30] sm:$0xff] }
 0x1ce   :  { %v1076_v62 = vmax.f32 %v835_v57, 0.0 }
 0x1cf   :  { %v1175_v53 = vpack.c.bf16 %v1098_v56, %v1097_v52 }
 0x1d0   :  { %v747_v58 = vpop.f32.mrf.mxu2  ;;  %v3192_v59 = vpop.f32.mrf.mxu3  ;;  %v1123_v3 = vmul.f32 %v3201_v44, %v1076_v62 }
 0x1d1   :  { %1295 = vmatmul.bf16.gmra.mxu0 %v1175_v53  ;;  %v748_v0 = vadd.f32 %v747_v58, %v3128_v36 }
 0x1d3   :  { %v836_v60 = vpop.f32.mrf.mxu1  ;;  %v3196_v1 = vpop.f32.mrf.mxu0  ;;  %v1073_v24 = vmax.f32 %v748_v0, 0.0 }
 0x1d4   :  { %v837_v63 = vadd.f32 %v836_v60, %v3120_v29 }
 0x1d5   :  { %v1099_v10 = vmul.f32 %v3201_v44, %v1073_v24 }
 0x1d6   :  { %v1086_v2 = vmax.f32 %v837_v63, 0.0 }
 0x1d8   :  { %v1124_v6 = vmul.f32 %v1086_v2, %v2560_v54  ;;  %v749_v7 = vpop.f32.mrf.mxu2  ;;  %v3205_v8 = vpop.f32.mrf.mxu3 }
 0x1d9   :  { %v750_v29 = vadd.f32 %v749_v7, %v3128_v36  ;;  %v3222_v36 = vperm.slane %v3115_v40, 1 }
 0x1da   :  { %v1188_v30 = vpack.c.bf16 %v1124_v6, %v1123_v3 }
 0x1db   :  { %v1083_v9 = vmax.f32 %v750_v29, 0.0  ;;  %v3208_v45 = vpop.f32.mrf.mxu1  ;;  %v3217_v13 = vpop.f32.mrf.mxu0  ;;  %v764_v19 = vadd.f32 %v3136_v55, %v3222_v36  ;;  %v762_v21 = vadd.f32 %v3125_v33, %v3222_v36  ;;  %v3242_v55 = vld [vmem:[%s3783_s9 + $0x8] sm:$0xff]  ;;  %v769_v58 = vadd.f32 %v3154_v11, %v3222_v36  ;;  %v3272_v11 = vld [vmem:[%s3783_s9 + $0x18] sm:$0xff] }
 0x1dc   :  { %1360 = vmatmul.bf16.gmra.mxu1 %v1188_v30  ;;  %v767_v63 = vadd.f32 %v3146_v4, %v3222_v36  ;;  %v3278_v4 = vld [vmem:[%s3783_s9 + $0x10] sm:$0xff] }
 0x1dd   :  { %v1100_v54 = vmul.f32 %v3214_v12, %v1083_v9  ;;  %v1024_v28 = vmax.f32 %v764_v19, 0.0  ;;  %v1014_v37 = vmax.f32 %v762_v21, 0.0  ;;  %v1044_v2 = vmax.f32 %v769_v58, 0.0 }
 0x1de   :  { %v1034_v7 = vmax.f32 %v767_v63, 0.0  ;;  %v3286_v21 = vperm.slane %v3115_v40, 7 }
 0x1df   :  { %v1176_v14 = vpack.c.bf16 %v1100_v54, %v1099_v10  ;;  %v1102_v46 = vmul.f32 %v3242_v55, %v1024_v28  ;;  %v1101_v48 = vmul.f32 %v3250_v42, %v1014_v37  ;;  %v1104_v30 = vmul.f32 %v3272_v11, %v1044_v2 }
 0x1e0   :  { %v848_v15 = vpop.f32.mrf.mxu2  ;;  %v3219_v17 = vpop.f32.mrf.mxu3  ;;  %v1103_v54 = vmul.f32 %v3278_v4, %v1034_v7 }
 0x1e1   :  { %1300 = vmatmul.bf16.gmra.mxu0 %v1176_v14  ;;  %v849_v22 = vadd.f32 %v848_v15, %v3225_v18  ;;  %v1177_v52 = vpack.c.bf16 %v1102_v46, %v1101_v48  ;;  %v3292_v46 = vperm.slane %v3115_v40, 5  ;;  %v772_v48 = vadd.f32 %v3164_v23, %v3222_v36 }
 0x1e3   :  { %v3229_v20 = vpop.f32.mrf.mxu1  ;;  %v1017_v34 = vmax.f32 %v849_v22, 0.0  ;;  %v3236_v25 = vpop.f32.mrf.mxu0  ;;  %v1178_v22 = vpack.c.bf16 %v1104_v30, %v1103_v54 }
 0x1e5   :  { %v1125_v49 = vmul.f32 %v3250_v42, %v1017_v34 }
 0x1e8   :  { %v850_v31 = vpop.f32.mrf.mxu2  ;;  %v3234_v32 = vpop.f32.mrf.mxu3 }
 0x1e9   :  { %v851_v38 = vadd.f32 %v850_v31, %v3225_v18 }
 0x1eb   :  { %v1027_v33 = vmax.f32 %v851_v38, 0.0  ;;  %v3245_v26 = vpop.f32.mrf.mxu1  ;;  %v3259_v60 = vpop.f32.mrf.mxu0  ;;  %v774_v38 = vadd.f32 %v3182_v47, %v3222_v36 }
 0x1ed   :  { %v1126_v51 = vmul.f32 %v3242_v55, %v1027_v33  ;;  %v1064_v58 = vmax.f32 %v774_v38, 0.0 }
 0x1ef   :  { %v1189_v56 = vpack.c.bf16 %v1126_v51, %v1125_v49 }
 0x1f0   :  { %v853_v53 = vpop.f32.mrf.mxu2  ;;  %v3255_v57 = vpop.f32.mrf.mxu3 }
 0x1f1   :  { %1305 = vmatmul.bf16.gmra.mxu0 %v1177_v52  ;;  %1365 = vmatmul.bf16.gmra.mxu1 %v1189_v56  ;;  %v854_v0 = vadd.f32 %v853_v53, %v3225_v18 }
 0x1f3   :  { %v3261_v62 = vpop.f32.mrf.mxu1  ;;  %v1037_v24 = vmax.f32 %v854_v0, 0.0  ;;  %v3282_v15 = vpop.f32.mrf.mxu0  ;;  %v1054_v0 = vmax.f32 %v772_v48, 0.0 }
 0x1f5   :  { %v1127_v14 = vmul.f32 %v3278_v4, %v1037_v24 }
 0x1f8   :  { %v855_v3 = vpop.f32.mrf.mxu2  ;;  %v3266_v6 = vpop.f32.mrf.mxu3 }
 0x1f9   :  { %v856_v29 = vadd.f32 %v855_v3, %v3225_v18 }
 0x1fb   :  { %v1047_v9 = vmax.f32 %v856_v29, 0.0  ;;  %v945_v10 = vpop.f32.mrf.mxu1  ;;  %v3299_v63 = vpop.f32.mrf.mxu0 }
 0x1fc   :  { %v946_v31 = vadd.f32 %v945_v10, %v3286_v21  ;;  %v1106_v10 = vmul.f32 %v3179_v35, %v1064_v58 }
 0x1fd   :  { %v1128_v19 = vmul.f32 %v3272_v11, %v1047_v9 }
 0x1fe   :  { %v1060_v49 = vmax.f32 %v946_v31, 0.0 }
 0x1ff   :  { %v1190_v28 = vpack.c.bf16 %v1128_v19, %v1127_v14 }
 0x200   :  { %v858_v37 = vpop.f32.mrf.mxu2  ;;  %v887_v34 = vpop.f32.mrf.mxu3  ;;  %v3302_v47 = vmul.f32 %v3173_v43, %v1060_v49 }
 0x201   :  { %1310 = vmatmul.bf16.gmra.mxu0 %v1178_v22  ;;  %1370 = vmatmul.bf16.gmra.mxu1 %v1190_v28  ;;  %v859_v52 = vadd.f32 %v858_v37, %v3225_v18  ;;  %v888_v56 = vadd.f32 %v887_v34, %v3292_v46  ;;  %v1105_v22 = vmul.f32 %v3173_v43, %v1054_v0 }
 0x202   :  { %v777_v0 = vadd.f32 %v3192_v59, %v3222_v36 }
 0x203   :  { %v947_v33 = vpop.f32.mrf.mxu1  ;;  %v1057_v7 = vmax.f32 %v859_v52, 0.0  ;;  %v1058_v24 = vmax.f32 %v888_v56, 0.0  ;;  %v3318_v56 = vpop.f32.mrf.mxu0 }
 0x204   :  { %v948_v51 = vadd.f32 %v947_v33, %v3286_v21  ;;  %v1179_v33 = vpack.c.bf16 %v1106_v10, %v1105_v22  ;;  %v1074_v10 = vmax.f32 %v777_v0, 0.0 }
 0x205   :  { %v1129_v28 = vmul.f32 %v3173_v43, %v1057_v7  ;;  %v1137_v31 = vmul.f32 %v3173_v43, %v1058_v24 }
 0x206   :  { %v1070_v53 = vmax.f32 %v948_v51, 0.0 }
 0x208   :  { %v3305_v2 = vmul.f32 %v3179_v35, %v1070_v53  ;;  %v860_v3 = vpop.f32.mrf.mxu2  ;;  %v889_v23 = vpop.f32.mrf.mxu3  ;;  %v779_v53 = vadd.f32 %v3205_v8, %v3222_v36 }
 0x209   :  { %v861_v29 = vadd.f32 %v860_v3, %v3225_v18  ;;  %v890_v30 = vadd.f32 %v889_v23, %v3292_v46 }
 0x20a   :  { %v1203_v9 = vpack.c.bf16 %v3305_v2, %v3302_v47 }
 0x20b   :  { %v1067_v54 = vmax.f32 %v861_v29, 0.0  ;;  %v1068_v14 = vmax.f32 %v890_v30, 0.0  ;;  %v950_v19 = vpop.f32.mrf.mxu1  ;;  %v1084_v30 = vmax.f32 %v779_v53, 0.0  ;;  %v3348_v53 = vld [vmem:[%s3786_s6 + $0x8] sm:$0x3]  ;;  %s2375_s6 = smov 48  }
 0x20c   :  { %v951_v49 = vadd.f32 %v950_v19, %v3286_v21 }
 0x20d   :  { %v1130_v37 = vmul.f32 %v3179_v35, %v1067_v54  ;;  %v1138_v34 = vmul.f32 %v3179_v35, %v1068_v14 }
 0x20e   :  { %v1080_v3 = vmax.f32 %v951_v49, 0.0 }
 0x20f   :  { %v1195_v38 = vpack.c.bf16 %v1138_v34, %v1137_v31  ;;  %v1191_v48 = vpack.c.bf16 %v1130_v37, %v1129_v28  ;;  %v1108_v37 = vmul.f32 %v3214_v12, %v1084_v30 }
 0x210   :  { %v863_v51 = vpop.f32.mrf.mxu2  ;;  %v892_v52 = vpop.f32.mrf.mxu3  ;;  %v3328_v54 = vmul.f32 %v3201_v44, %v1080_v3 }
 0x211   :  { %1315 = vmatmul.bf16.gmra.mxu0 %v1179_v33  ;;  %1375 = vmatmul.bf16.gmra.mxu1 %v1191_v48  ;;  %v864_v7 = vadd.f32 %v863_v51, %v3225_v18  ;;  %v893_v24 = vadd.f32 %v892_v52, %v3292_v46  ;;  %v1107_v33 = vmul.f32 %v3201_v44, %v1074_v10  ;;  %v3339_v48 = vpop.f32.mrf.mxu0 }
 0x212   :  { %1395 = vmatmul.bf16.vlgmr.msrb.gmra.mxu2 %v1195_v38  ;;  %v880_v10 = vadd.f32 %v3234_v32, %v3292_v46 }
 0x213   :  { %v952_v58 = vpop.f32.mrf.mxu1  ;;  %v1077_v22 = vmax.f32 %v864_v7, 0.0  ;;  %v1078_v59 = vmax.f32 %v893_v24, 0.0  ;;  %v3351_v7 = vperm.slane %v3115_v40, 2  ;;  %v3354_v24 = vperm.slane %v3348_v53, 0 }
 0x214   :  { %v953_v23 = vadd.f32 %v952_v58, %v3286_v21  ;;  %v1180_v58 = vpack.c.bf16 %v1108_v37, %v1107_v33 }
 0x215   :  { %v1131_v49 = vmul.f32 %v3201_v44, %v1077_v22  ;;  %v1139_v51 = vmul.f32 %v3201_v44, %v1078_v59  ;;  %v793_v30 = vadd.f32 %v3130_v39, %v3351_v7  ;;  %v878_v22 = vadd.f32 %v3219_v17, %v3292_v46 }
 0x216   :  { %v1090_v29 = vmax.f32 %v953_v23, 0.0 }
 0x217   :  { %v1025_v39 = vmax.f32 %v793_v30, 0.0 }
 0x218   :  { %v3331_v14 = vmul.f32 %v3214_v12, %v1090_v29  ;;  %v865_v8 = vpop.f32.mrf.mxu2  ;;  %v894_v19 = vpop.f32.mrf.mxu3  ;;  %v3357_v29 = vperm.slane %v3115_v40, 6 }
 0x219   :  { %v866_v36 = vadd.f32 %v865_v8, %v3225_v18  ;;  %v895_v28 = vadd.f32 %v894_v19, %v3292_v46  ;;  %v791_v19 = vadd.f32 %v3117_v41, %v3351_v7  ;;  %v1110_v17 = vmul.f32 %v3242_v55, %v1025_v39 }
 0x21a   :  { %v1204_v31 = vpack.c.bf16 %v3331_v14, %v3328_v54  ;;  %v909_v8 = vadd.f32 %v3236_v25, %v3357_v29  ;;  %v907_v40 = vadd.f32 %v3217_v13, %v3357_v29  ;;  %v798_v39 = vadd.f32 %v3148_v5, %v3351_v7 }
 0x21b   :  { %v1087_v34 = vmax.f32 %v866_v36, 0.0  ;;  %v1088_v38 = vmax.f32 %v895_v28, 0.0  ;;  %v3372_v36 = vpop.f32.mrf.mxu0  ;;  %v1028_v28 = vmax.f32 %v880_v10, 0.0 }
 0x21c   :  { %v1029_v37 = vmax.f32 %v909_v8, 0.0  ;;  %v1045_v5 = vmax.f32 %v798_v39, 0.0 }
 0x21d   :  { %v1132_v52 = vmul.f32 %v3214_v12, %v1087_v34  ;;  %v1140_v18 = vmul.f32 %v3214_v12, %v1088_v38  ;;  %v1015_v34 = vmax.f32 %v791_v19, 0.0  ;;  %v1018_v38 = vmax.f32 %v878_v22, 0.0 }
 0x21e   :  { %v1134_v13 = vmul.f32 %v3242_v55, %v1028_v28  ;;  %v885_v28 = vadd.f32 %v3266_v6, %v3292_v46 }
 0x21f   :  { %v1192_v0 = vpack.c.bf16 %v1132_v52, %v1131_v49  ;;  %v1196_v3 = vpack.c.bf16 %v1140_v18, %v1139_v51  ;;  %v1019_v49 = vmax.f32 %v907_v40, 0.0  ;;  %v1142_v52 = vmul.f32 %v3242_v55, %v1029_v37 }
 0x220   :  { %v964_v23 = vpop.f32.mrf.mxu2  ;;  %v1109_v18 = vmul.f32 %v3250_v42, %v1015_v34  ;;  %v914_v37 = vadd.f32 %v3282_v15, %v3357_v29  ;;  %v883_v34 = vadd.f32 %v3255_v57, %v3292_v46  ;;  %v1112_v57 = vmul.f32 %v3272_v11, %v1045_v5 }
 0x221   :  { %1320 = vmatmul.bf16.gmra.mxu0 %v1180_v58  ;;  %1380 = vmatmul.bf16.gmra.mxu1 %v1192_v0  ;;  %v965_v59 = vadd.f32 %v964_v23, %v3354_v24  ;;  %v1133_v58 = vmul.f32 %v3250_v42, %v1018_v38  ;;  %v1141_v23 = vmul.f32 %v3250_v42, %v1019_v49 }
 0x222   :  { %1400 = vmatmul.bf16.gmra.mxu2 %v1196_v3  ;;  %v1181_v8 = vpack.c.bf16 %v1110_v17, %v1109_v18  ;;  %v1049_v6 = vmax.f32 %v914_v37, 0.0  ;;  %v803_v37 = vadd.f32 %v3166_v27, %v3351_v7 }
 0x223   :  { %v1021_v25 = vmax.f32 %v965_v59, 0.0  ;;  %v1193_v19 = vpack.c.bf16 %v1134_v13, %v1133_v58  ;;  %v1197_v59 = vpack.c.bf16 %v1142_v52, %v1141_v23  ;;  %v1038_v13 = vmax.f32 %v883_v34, 0.0 }
 0x224   :  { %v1144_v18 = vmul.f32 %v3272_v11, %v1049_v6  ;;  %v801_v34 = vadd.f32 %v3157_v16, %v3351_v7 }
 0x225   :  { %v1157_v0 = vmul.f32 %v3250_v42, %v1021_v25  ;;  %v912_v25 = vadd.f32 %v3259_v60, %v3357_v29 }
 0x227   :  { %v1039_v52 = vmax.f32 %v912_v25, 0.0  ;;  %v917_v25 = vadd.f32 %v3299_v63, %v3357_v29 }
 0x228   :  { %v966_v32 = vpop.f32.mrf.mxu2 }
 0x229   :  { %v967_v33 = vadd.f32 %v966_v32, %v3354_v24  ;;  %v1346_v41 = vpop.f32.mrf.mxu1  ;;  %v796_v32 = vadd.f32 %v3139_v61, %v3351_v7 }
 0x22a   :  { %1558 = vrot.lane.b32.xlu1 %v1346_v41, %s2375_s6  ;;  %v1048_v41 = vmax.f32 %v885_v28, 0.0 }
 0x22b   :  { %v1031_v51 = vmax.f32 %v967_v33, 0.0  ;;  %v1035_v17 = vmax.f32 %v796_v32, 0.0  ;;  %v919_v32 = vadd.f32 %v3318_v56, %v3357_v29  ;;  %v993_v56 = vpop.f32.mrf.mxu3 }
 0x22c   :  { %v1136_v46 = vmul.f32 %v3272_v11, %v1048_v41  ;;  %v1065_v41 = vmax.f32 %v803_v37, 0.0 }
 0x22d   :  { %v1158_v3 = vmul.f32 %v3242_v55, %v1031_v51  ;;  %v1111_v58 = vmul.f32 %v3278_v4, %v1035_v17  ;;  %v1069_v6 = vmax.f32 %v919_v32, 0.0  ;;  %v1055_v17 = vmax.f32 %v801_v34, 0.0 }
 0x22e   :  { %v3384_v30 = vpop.f32.mrf.mxu0  ;;  %v1114_v16 = vmul.f32 %v3179_v35, %v1065_v41 }
 0x22f   :  { %v1205_v10 = vpack.c.bf16 %v1158_v3, %v1157_v0  ;;  %v1135_v0 = vmul.f32 %v3278_v4, %v1038_v13  ;;  %v1113_v63 = vmul.f32 %v3173_v43, %v1055_v17 }
 0x230   :  { %v969_v22 = vpop.f32.mrf.mxu2 }
 0x231   :  { %v1348_v40 = vpop.f32.mrf.mxu1  ;;  %1325 = vmatmul.bf16.gmra.mxu0 %v1181_v8  ;;  %1385 = vmatmul.bf16.gmra.mxu1 %v1193_v19  ;;  %v970_v38 = vadd.f32 %v969_v22, %v3354_v24  ;;  %v1182_v19 = vpack.c.bf16 %v1112_v57, %v1111_v58  ;;  %v1194_v22 = vpack.c.bf16 %v1136_v46, %v1135_v0 }
 0x232   :  { %1560 = vrot.lane.b32.xlu2 %v1348_v40, %s2375_s6  ;;  %1405 = vmatmul.bf16.gmra.mxu2 %v1197_v59  ;;  %v1183_v58 = vpack.c.bf16 %v1114_v16, %v1113_v63  ;;  %v938_v63 = vadd.f32 %v3229_v20, %v3286_v21 }
 0x233   :  { %1445 = vmatmul.bf16.vlgmr.msra.gmra.mxu3 %v1205_v10  ;;  %v1041_v15 = vmax.f32 %v970_v38, 0.0  ;;  %v1143_v10 = vmul.f32 %v3278_v4, %v1039_v52  ;;  %v1146_v52 = vmul.f32 %v3179_v35, %v1069_v6 }
 0x235   :  { %v1159_v3 = vmul.f32 %v3278_v4, %v1041_v15  ;;  %v1198_v39 = vpack.c.bf16 %v1144_v18, %v1143_v10 }
 0x236   :  { %v3400_v33 = vpop.f32.mrf.mxu0 }
 0x238   :  { %v971_v49 = vpop.f32.mrf.mxu2 }
 0x239   :  { %v972_v51 = vadd.f32 %v971_v49, %v3354_v24  ;;  %v1351_v61 = vpop.f32.mrf.mxu1 }
 0x23a   :  { %1562 = vrot.lane.b32.xlu0 %v1351_v61, %s2375_s6 }
 0x23b   :  { %v1051_v60 = vmax.f32 %v972_v51, 0.0  ;;  %v1059_v51 = vmax.f32 %v917_v25, 0.0 }
 0x23d   :  { %v1160_v23 = vmul.f32 %v3272_v11, %v1051_v60  ;;  %v1145_v60 = vmul.f32 %v3173_v43, %v1059_v51 }
 0x23e   :  { %v3412_v8 = vpop.f32.mrf.mxu0 }
 0x23f   :  { %v1206_v59 = vpack.c.bf16 %v1160_v23, %v1159_v3  ;;  %v1199_v23 = vpack.c.bf16 %v1146_v52, %v1145_v60  ;;  %v3460_v52 = vperm.slane %v3348_v53, 1 }
 0x240   :  { %v974_v40 = vpop.f32.mrf.mxu2 }
 0x241   :  { %v1353_v28 = vpop.f32.mrf.mxu1  ;;  %1330 = vmatmul.bf16.gmra.mxu0 %v1182_v19  ;;  %1390 = vmatmul.bf16.gmra.mxu1 %v1194_v22  ;;  %v975_v38 = vadd.f32 %v974_v40, %v3354_v24  ;;  %v808_v19 = vadd.f32 %v3196_v1, %v3351_v7  ;;  %v924_v22 = vadd.f32 %v3372_v36, %v3357_v29  ;;  %v995_v40 = vpop.f32.mrf.mxu3 }
 0x242   :  { %1564 = vrot.lane.b32.xlu1 %v1353_v28, %s2375_s6  ;;  %1410 = vmatmul.bf16.gmra.mxu2 %v1198_v39  ;;  %v922_v28 = vadd.f32 %v3339_v48, %v3357_v29 }
 0x243   :  { %1450 = vmatmul.bf16.gmra.mxu3 %v1206_v59  ;;  %v1061_v13 = vmax.f32 %v975_v38, 0.0  ;;  %v806_v59 = vadd.f32 %v3185_v50, %v3351_v7  ;;  %v1085_v32 = vmax.f32 %v808_v19, 0.0  ;;  %v1089_v34 = vmax.f32 %v924_v22, 0.0 }
 0x244   :  { %v1079_v36 = vmax.f32 %v922_v28, 0.0 }
 0x245   :  { %v1161_v57 = vmul.f32 %v3173_v43, %v1061_v13  ;;  %v1075_v25 = vmax.f32 %v806_v59, 0.0  ;;  %v1116_v50 = vmul.f32 %v3214_v12, %v1085_v32  ;;  %v943_v32 = vadd.f32 %v3261_v62, %v3286_v21 }
 0x246   :  { %v3424_v5 = vpop.f32.mrf.mxu0  ;;  %v1147_v13 = vmul.f32 %v3201_v44, %v1079_v36 }
 0x247   :  { %v1115_v48 = vmul.f32 %v3201_v44, %v1075_v25 }
 0x248   :  { %v976_v49 = vpop.f32.mrf.mxu2 }
 0x249   :  { %v977_v27 = vadd.f32 %v976_v49, %v3354_v24  ;;  %v1356_v15 = vpop.f32.mrf.mxu1  ;;  %v1148_v49 = vmul.f32 %v3214_v12, %v1089_v34 }
 0x24a   :  { %1566 = vrot.lane.b32.xlu2 %v1356_v15, %s2375_s6  ;;  %v1184_v15 = vpack.c.bf16 %v1116_v50, %v1115_v48 }
 0x24b   :  { %v1071_v61 = vmax.f32 %v977_v27, 0.0  ;;  %v1200_v16 = vpack.c.bf16 %v1148_v49, %v1147_v13 }
 0x24d   :  { %v1162_v46 = vmul.f32 %v3179_v35, %v1071_v61 }
 0x24e   :  { %v3434_v18 = vpop.f32.mrf.mxu0 }
 0x24f   :  { %v1207_v0 = vpack.c.bf16 %v1162_v46, %v1161_v57  ;;  %v996_v57 = vadd.f32 %v995_v40, %v3460_v52  ;;  %v936_v46 = vadd.f32 %v3208_v45, %v3286_v21 }
 0x250   :  { %v979_v3 = vpop.f32.mrf.mxu2 }
 0x251   :  { %v1358_v10 = vpop.f32.mrf.mxu1  ;;  %1335 = vmatmul.bf16.gmra.mxu0 %v1183_v58  ;;  %v980_v39 = vadd.f32 %v979_v3, %v3354_v24  ;;  %v994_v58 = vadd.f32 %v993_v56, %v3460_v52  ;;  %v1032_v3 = vmax.f32 %v996_v57, 0.0 }
 0x252   :  { %1568 = vrot.lane.b32.xlu0 %v1358_v10, %s2375_s6  ;;  %1415 = vmatmul.bf16.gmra.mxu2 %v1199_v23  ;;  %v1020_v10 = vmax.f32 %v936_v46, 0.0 }
 0x253   :  { %1455 = vmatmul.bf16.gmra.mxu3 %v1207_v0  ;;  %v1081_v1 = vmax.f32 %v980_v39, 0.0  ;;  %v1030_v0 = vmax.f32 %v938_v63, 0.0  ;;  %v1022_v19 = vmax.f32 %v994_v58, 0.0  ;;  %v1166_v22 = vmul.f32 %v3242_v55, %v1032_v3 }
 0x254   :  { %v1149_v20 = vmul.f32 %v3250_v42, %v1020_v10 }
 0x255   :  { %v1163_v29 = vmul.f32 %v3201_v44, %v1081_v1  ;;  %v1150_v53 = vmul.f32 %v3242_v55, %v1030_v0  ;;  %v1165_v39 = vmul.f32 %v3250_v42, %v1022_v19  ;;  %v941_v55 = vadd.f32 %v3245_v26, %v3286_v21 }
 0x256   :  { %v3446_v37 = vpop.f32.mrf.mxu0  ;;  %v1050_v1 = vmax.f32 %v943_v32, 0.0 }
 0x257   :  { %v1201_v45 = vpack.c.bf16 %v1150_v53, %v1149_v20  ;;  %v1209_v56 = vpack.c.bf16 %v1166_v22, %v1165_v39 }
 0x258   :  { %v981_v38 = vpop.f32.mrf.mxu2  ;;  %v1152_v62 = vmul.f32 %v3272_v11, %v1050_v1 }
 0x259   :  { %v982_v41 = vadd.f32 %v981_v38, %v3354_v24  ;;  %v1361_v6 = vpop.f32.mrf.mxu1  ;;  %v998_v24 = vpop.f32.mrf.mxu3 }
 0x25a   :  { %1570 = vrot.lane.b32.xlu1 %v1361_v6, %s2375_s6  ;;  %v999_v42 = vadd.f32 %v998_v24, %v3460_v52  ;;  %v1040_v6 = vmax.f32 %v941_v55, 0.0 }
 0x25b   :  { %v1091_v7 = vmax.f32 %v982_v41, 0.0 }
 0x25c   :  { %v1042_v36 = vmax.f32 %v999_v42, 0.0  ;;  %v1151_v26 = vmul.f32 %v3278_v4, %v1040_v6 }
 0x25d   :  { %v1164_v17 = vmul.f32 %v3214_v12, %v1091_v7 }
 0x25e   :  { %v3456_v27 = vpop.f32.mrf.mxu0  ;;  %v1167_v48 = vmul.f32 %v3278_v4, %v1042_v36 }
 0x25f   :  { %v1208_v51 = vpack.c.bf16 %v1164_v17, %v1163_v29  ;;  %v1202_v29 = vpack.c.bf16 %v1152_v62, %v1151_v26 }
 0x261   :  { %v1363_v61 = vpop.f32.mrf.mxu1  ;;  %1340 = vmatmul.bf16.gmra.mxu0 %v1184_v15  ;;  %v1000_v23 = vpop.f32.mrf.mxu3 }
 0x262   :  { %1572 = vrot.lane.b32.xlu2 %v1363_v61, %s2375_s6  ;;  %1420 = vmatmul.bf16.gmra.mxu2 %v1200_v16  ;;  %v1001_v34 = vadd.f32 %v1000_v23, %v3460_v52 }
 0x263   :  { %1460 = vmatmul.bf16.gmra.mxu3 %v1208_v51 }
 0x264   :  { %v1052_v41 = vmax.f32 %v1001_v34, 0.0 }
 0x266   :  { %v3467_v60 = vpop.f32.mrf.mxu0  ;;  %v1168_v50 = vmul.f32 %v3272_v11, %v1052_v41 }
 0x268   :  { %v1210_v17 = vpack.c.bf16 %v1168_v50, %v1167_v48 }
 0x269   :  { %v1003_v28 = vpop.f32.mrf.mxu3 }
 0x26a   :  { %v1004_v15 = vadd.f32 %v1003_v28, %v3460_v52 }
 0x26c   :  { %v1062_v16 = vmax.f32 %v1004_v15, 0.0 }
 0x26e   :  { %v1306_v59 = vpop.f32.mrf.mxu0  ;;  %v1366_v40 = vpop.f32.mrf.mxu1  ;;  %v1169_v46 = vmul.f32 %v3173_v43, %v1062_v16 }
 0x26f   :  { %1494 = vrot.lane.b32.xlu0 %v1306_v59, %s2376_s11 }
 0x271   :  { %v1005_v7 = vpop.f32.mrf.mxu3 }
 0x272   :  { %1425 = vmatmul.bf16.gmra.mxu2 %v1201_v45  ;;  %v1006_v13 = vadd.f32 %v1005_v7, %v3460_v52 }
 0x273   :  { %1465 = vmatmul.bf16.gmra.mxu3 %v1209_v56 }
 0x274   :  { %v1072_v4 = vmax.f32 %v1006_v13, 0.0 }
 0x276   :  { %v1308_v38 = vpop.f32.mrf.mxu0  ;;  %v1368_v25 = vpop.f32.mrf.mxu1  ;;  %v1170_v61 = vmul.f32 %v3179_v35, %v1072_v4 }
 0x277   :  { %1592 = vrot.lane.b32.xlu1 %v1368_v25, %s2377_s12  ;;  %1590 = vrot.lane.b32.xlu0 %v1366_v40, %s2377_s12 }
 0x278   :  { %v1211_v58 = vpack.c.bf16 %v1170_v61, %v1169_v46 }
 0x279   :  { %v1008_v51 = vpop.f32.mrf.mxu3 }
 0x27a   :  { %v1009_v43 = vadd.f32 %v1008_v51, %v3460_v52 }
 0x27c   :  { %v1082_v53 = vmax.f32 %v1009_v43, 0.0 }
 0x27e   :  { %v1311_v21 = vpop.f32.mrf.mxu0  ;;  %v1371_v49 = vpop.f32.mrf.mxu1 }
 0x27f   :  { %1594 = vrot.lane.b32.xlu2 %v1371_v49, %s2377_s12  ;;  %1496 = vrot.lane.b32.xlu0 %v1308_v38, %s2376_s11 }
 0x280   :  { %1498 = vrot.lane.b32.xlu1 %v1311_v21, %s2376_s11 }
 0x281   :  { %v1010_v0 = vpop.f32.mrf.mxu3 }
 0x282   :  { %1430 = vmatmul.bf16.gmra.mxu2 %v1202_v29  ;;  %v1011_v3 = vadd.f32 %v1010_v0, %v3460_v52 }
 0x283   :  { %1470 = vmatmul.bf16.gmra.mxu3 %v1210_v17 }
 0x284   :  { %v1092_v19 = vmax.f32 %v1011_v3, 0.0 }
 0x286   :  { %v1313_v11 = vpop.f32.mrf.mxu0  ;;  %v1373_v24 = vpop.f32.mrf.mxu1  ;;  %v1172_v22 = vmul.f32 %v3214_v12, %v1092_v19 }
 0x287   :  { %1596 = vrot.lane.b32.xlu0 %v1373_v24, %s2377_s12 }
 0x288   :  { %1500 = vrot.lane.b32.xlu1 %v1313_v11, %s2376_s11 }
 0x28c   :  { %v3534_v1 = vpop.permute.xlu2 %1560 }
 0x28e   :  { %v1316_v63 = vpop.f32.mrf.mxu0  ;;  %v1376_v57 = vpop.f32.mrf.mxu1 }
 0x28f   :  { %1502 = vrot.lane.b32.xlu2 %v1316_v63, %s2376_s11 }
 0x290   :  { %1598 = vrot.lane.b32.xlu1 %v1376_v57, %s2377_s12 }
 0x292   :  { %1435 = vmatmul.bf16.gmra.mxu2 %v1203_v9  ;;  %v1171_v9 = vmul.f32 %v3201_v44, %v1082_v53 }
 0x293   :  { %1475 = vmatmul.bf16.gmra.mxu3 %v1211_v58 }
 0x294   :  { %v1212_v59 = vpack.c.bf16 %v1172_v22, %v1171_v9 }
 0x295   :  { %v1396_v23 = vpop.f32.mrf.mxu2 }
 0x296   :  { %1630 = vrot.lane.b32.xlu0 %v1396_v23, %s2378_s13  ;;  %v1318_v35 = vpop.f32.mrf.mxu0  ;;  %v1378_v10 = vpop.f32.mrf.mxu1 }
 0x297   :  { %1504 = vrot.lane.b32.xlu2 %v1318_v35, %s2376_s11 }
 0x29c   :  { %v1559_v26 = vpop.permute.xlu1 %1558 }
 0x29d   :  { %v1398_v20 = vpop.f32.mrf.mxu2 }
 0x29e   :  { %1632 = vrot.lane.b32.xlu1 %v1398_v20, %s2378_s13  ;;  %v1321_v47 = vpop.f32.mrf.mxu0  ;;  %v1381_v2 = vpop.f32.mrf.mxu1 }
 0x29f   :  { %1600 = vrot.lane.b32.xlu2 %v1378_v10, %s2377_s12  ;;  %1506 = vrot.lane.b32.xlu0 %v1321_v47, %s2376_s11 }
 0x2a2   :  { %1440 = vmatmul.bf16.gmra.mxu2 %v1204_v31 }
 0x2a3   :  { %1480 = vmatmul.bf16.gmra.mxu3 %v1212_v59 }
 0x2a4   :  { %v3541_v50 = vpop.permute.xlu2 %1566 }
 0x2a5   :  { %v1401_v52 = vpop.f32.mrf.mxu2 }
 0x2a6   :  { %v1323_v40 = vpop.f32.mrf.mxu0  ;;  %v1383_v12 = vpop.f32.mrf.mxu1 }
 0x2a7   :  { %1634 = vrot.lane.b32.xlu2 %v1401_v52, %s2378_s13  ;;  %1602 = vrot.lane.b32.xlu0 %v1381_v2, %s2377_s12 }
 0x2a8   :  { %1508 = vrot.lane.b32.xlu1 %v1323_v40, %s2376_s11 }
 0x2ac   :  { %v3543_v7 = vpop.permute.xlu0 %1562 }
 0x2ad   :  { %v1403_v44 = vpop.f32.mrf.mxu2 }
 0x2ae   :  { %v1326_v39 = vpop.f32.mrf.mxu0  ;;  %v1386_v45 = vpop.f32.mrf.mxu1 }
 0x2af   :  { %1636 = vrot.lane.b32.xlu0 %v1403_v44, %s2378_s13  ;;  %1526 = vrot.lane.b32.xlu2 %v1326_v39, %s2379_s14 }
 0x2b0   :  { %1604 = vrot.lane.b32.xlu1 %v1383_v12, %s2377_s12 }
 0x2b4   :  { %v3553_v13 = vpop.permute.xlu1 %1564 }
 0x2b5   :  { %v1406_v54 = vpop.f32.mrf.mxu2 }
 0x2b6   :  { %v3519_v14 = vpop.f32.mrf.mxu3  ;;  %v1328_v31 = vpop.f32.mrf.mxu0 }
 0x2b7   :  { %1622 = vrot.lane.b32.xlu2 %v1386_v45, %s2378_s13  ;;  %1528 = vrot.lane.b32.xlu0 %v1328_v31, %s2379_s14  ;;  %v1388_v56 = vpop.f32.mrf.mxu1 }
 0x2b8   :  { %1654 = vrot.lane.b32.xlu1 %v1406_v54, %s2380_s15 }
 0x2bc   :  { %v3549_v29 = vpop.permute.xlu2 %1572 }
 0x2bd   :  { %v1408_v28 = vpop.f32.mrf.mxu2 }
 0x2be   :  { %v3524_v32 = vpop.f32.mrf.mxu3  ;;  %v1331_v34 = vpop.f32.mrf.mxu0 }
 0x2bf   :  { %1656 = vrot.lane.b32.xlu2 %v1408_v28, %s2380_s15  ;;  %1624 = vrot.lane.b32.xlu0 %v1388_v56, %s2378_s13  ;;  %v1391_v55 = vpop.f32.mrf.mxu1 }
 0x2c0   :  { %1530 = vrot.lane.b32.xlu1 %v1331_v34, %s2379_s14 }
 0x2c4   :  { %v3551_v17 = vpop.permute.xlu0 %1568 }
 0x2c5   :  { %v1411_v38 = vpop.f32.mrf.mxu2 }
 0x2c6   :  { %v3529_v25 = vpop.f32.mrf.mxu3  ;;  %v1333_v42 = vpop.f32.mrf.mxu0 }
 0x2c7   :  { %1658 = vrot.lane.b32.xlu0 %v1411_v38, %s2380_s15  ;;  %1532 = vrot.lane.b32.xlu2 %v1333_v42, %s2379_s14  ;;  %v1393_v41 = vpop.f32.mrf.mxu1 }
 0x2c8   :  { %1626 = vrot.lane.b32.xlu1 %v1391_v55, %s2378_s13 }
 0x2cc   :  { %v3561_v16 = vpop.permute.xlu1 %1570 }
 0x2cd   :  { %v1413_v6 = vpop.f32.mrf.mxu2 }
 0x2ce   :  { %v3536_v36 = vpop.f32.mrf.mxu3  ;;  %v1336_v62 = vpop.f32.mrf.mxu0 }
 0x2cf   :  { %1628 = vrot.lane.b32.xlu2 %v1393_v41, %s2378_s13  ;;  %1534 = vrot.lane.b32.xlu0 %v1336_v62, %s2379_s14 }
 0x2d0   :  { %1660 = vrot.lane.b32.xlu1 %v1413_v6, %s2380_s15 }
 0x2d5   :  { %v1416_v21 = vpop.f32.mrf.mxu2 }
 0x2d6   :  { %v3545_v49 = vpop.f32.mrf.mxu3  ;;  %v1338_v48 = vpop.f32.mrf.mxu0 }
 0x2d7   :  { %1662 = vrot.lane.b32.xlu2 %v1416_v21, %s2380_s15 }
 0x2d8   :  { %1536 = vrot.lane.b32.xlu1 %v1338_v48, %s2379_s14 }
 0x2d9   :  { %v3559_v51 = vpop.permute.xlu2 %1594 }
 0x2dd   :  { %v1418_v11 = vpop.f32.mrf.mxu2 }
 0x2de   :  { %v3555_v24 = vpop.f32.mrf.mxu3  ;;  %1664 = vrot.lane.b32.xlu0 %v1418_v11, %s2380_s15  ;;  %v1341_v15 = vpop.f32.mrf.mxu0 }
 0x2df   :  { %1538 = vrot.lane.b32.xlu2 %v1341_v15, %s2379_s14 }
 0x2e1   :  { %v1495_v4 = vpop.permute.xlu0 %1494 }
 0x2e2   :  { %v1742_v44 = vsel %vm56_vm0, %v3384_v30, %v1495_v4 }
 0x2e5   :  { %v1421_v61 = vpop.f32.mrf.mxu2 }
 0x2e6   :  { %v3563_v63 = vpop.f32.mrf.mxu3  ;;  %1666 = vrot.lane.b32.xlu1 %v1421_v61, %s2380_s15  ;;  %v1343_v57 = vpop.f32.mrf.mxu0 }
 0x2e7   :  { %1540 = vrot.lane.b32.xlu0 %v1343_v57, %s2379_s14 }
 0x2e9   :  { %v3567_v46 = vpop.permute.xlu2 %1502  ;;  %v3569_v58 = vpop.permute.xlu1 %1592 }
 0x2ea   :  { %v1591_v0 = vpop.permute.xlu0 %1590 }
 0x2ed   :  { %v1423_v3 = vpop.f32.mrf.mxu2 }
 0x2ee   :  { %v3571_v23 = vpop.f32.mrf.mxu3  ;;  %1668 = vrot.lane.b32.xlu2 %v1423_v3, %s2380_s15 }
 0x2f1   :  { %v3574_v35 = vpop.permute.xlu2 %1504 }
 0x2f2   :  { %v3576_v43 = vpop.permute.xlu1 %1498  ;;  %v1497_v53 = vpop.permute.xlu0 %1496 }
 0x2f5   :  { %v1426_v10 = vpop.f32.mrf.mxu2 }
 0x2f6   :  { %v1466_v19 = vpop.f32.mrf.mxu3  ;;  %1686 = vrot.lane.b32.xlu0 %v1426_v10, %s2381_s5 }
 0x2f7   :  { %1718 = vrot.lane.b32.xlu2 %v1466_v19, %s2376_s11 }
 0x2f9   :  { %v3580_v22 = vpop.permute.xlu2 %1600 }
 0x2fa   :  { %v1501_v2 = vpop.permute.xlu1 %1500  ;;  %v1597_v9 = vpop.permute.xlu0 %1596 }
 0x2fb   :  { %v1745_v4 = vsel %vm56_vm0, %v3424_v5, %v1501_v2 }
 0x2fd   :  { %v1428_v20 = vpop.f32.mrf.mxu2 }
 0x2fe   :  { %v1468_v47 = vpop.f32.mrf.mxu3  ;;  %1688 = vrot.lane.b32.xlu1 %v1428_v20, %s2381_s5 }
 0x2ff   :  { %1720 = vrot.lane.b32.xlu0 %v1468_v47, %s2376_s11  ;;  %v1743_v47 = vsel %vm56_vm0, %v3400_v33, %v1497_v53 }
 0x301   :  { %v3584_v59 = vpop.permute.xlu2 %1634 }
 0x302   :  { %v3592_v39 = vpop.permute.xlu1 %1598 }
 0x305   :  { %v1431_v52 = vpop.f32.mrf.mxu2 }
 0x306   :  { %v1471_v40 = vpop.f32.mrf.mxu3  ;;  %1690 = vrot.lane.b32.xlu2 %v1431_v52, %s2381_s5 }
 0x307   :  { %1722 = vrot.lane.b32.xlu1 %v1471_v40, %s2376_s11 }
 0x308   :  { %v3588_v12 = vpop.permute.xlu0 %1630 }
 0x309   :  { %v1527_v45 = vpop.permute.xlu2 %1526 }
 0x30a   :  { %v1751_v54 = vsel %vm1750_vm1, %v1742_v44, %v1527_v45 }
 0x30b   :  { %v1760_v31 = vsel %vm1759_vm2, %v1751_v54, %v1559_v26 }
 0x30c   :  { %v1769_v28 = vsel %vm1768_vm3, %v1760_v31, %v1591_v0 }
 0x30d   :  { %v1433_v56 = vpop.f32.mrf.mxu2 }
 0x30e   :  { %v1473_v34 = vpop.f32.mrf.mxu3  ;;  %1692 = vrot.lane.b32.xlu0 %v1433_v56, %s2381_s5 }
 0x30f   :  { %1724 = vrot.lane.b32.xlu2 %v1473_v34, %s2376_s11 }
 0x310   :  { %v3599_v38 = vpop.permute.xlu1 %1632 }
 0x311   :  { %v1507_v55 = vpop.permute.xlu0 %1506  ;;  %v1623_v30 = vpop.permute.xlu2 %1622 }
 0x312   :  { %v3602_v42 = vsel %vm1777_vm4, %v1769_v28, %v1623_v30 }
 0x315   :  { %v1436_v41 = vpop.f32.mrf.mxu2 }
 0x316   :  { %v1476_v6 = vpop.f32.mrf.mxu3  ;;  %1694 = vrot.lane.b32.xlu1 %v1436_v41, %s2381_s5 }
 0x317   :  { %1726 = vrot.lane.b32.xlu0 %v1476_v6, %s2376_s11 }
 0x319   :  { %v1603_v62 = vpop.permute.xlu0 %1602  ;;  %v1657_v21 = vpop.permute.xlu2 %1656 }
 0x31a   :  { %v3606_v26 = vpop.permute.xlu1 %1508 }
 0x31d   :  { %v1438_v48 = vpop.f32.mrf.mxu2 }
 0x31e   :  { %v1478_v11 = vpop.f32.mrf.mxu3  ;;  %1696 = vrot.lane.b32.xlu2 %v1438_v48, %s2381_s5 }
 0x321   :  { %v3609_v15 = vpop.permute.xlu0 %1636  ;;  %v1533_v57 = vpop.permute.xlu2 %1532 }
 0x322   :  { %v3613_v61 = vpop.permute.xlu1 %1604  ;;  %v1754_v0 = vsel %vm1750_vm1, %v1745_v4, %v1533_v57 }
 0x323   :  { %v1763_v3 = vsel %vm1759_vm2, %v1754_v0, %v3553_v13 }
 0x324   :  { %v1772_v19 = vsel %vm1768_vm3, %v1763_v3, %v1597_v9 }
 0x325   :  { %v1441_v10 = vpop.f32.mrf.mxu2 }
 0x326   :  { %v1481_v20 = vpop.f32.mrf.mxu3  ;;  %1698 = vrot.lane.b32.xlu0 %v1441_v10, %s2381_s5 }
 0x327   :  { %1730 = vrot.lane.b32.xlu2 %v1481_v20, %s2376_s11 }
 0x329   :  { %v1529_v5 = vpop.permute.xlu0 %1528  ;;  %v1629_v40 = vpop.permute.xlu2 %1628 }
 0x32a   :  { %v3623_v2 = vpop.permute.xlu1 %1654  ;;  %v1752_v52 = vsel %vm1750_vm1, %v1743_v47, %v1529_v5  ;;  %v3629_v44 = vsel %vm1777_vm4, %v1772_v19, %v1629_v40 }
 0x32b   :  { %v1761_v13 = vsel %vm1759_vm2, %v1752_v52, %v3534_v1 }
 0x32c   :  { %v1770_v9 = vsel %vm1768_vm3, %v1761_v13, %v3569_v58  ;;  %v1748_v58 = vsel %vm56_vm0, %v3456_v27, %v1507_v55 }
 0x32d   :  { %v1443_v45 = vpop.f32.mrf.mxu2 }
 0x32e   :  { %v1483_v54 = vpop.f32.mrf.mxu3  ;;  %1700 = vrot.lane.b32.xlu1 %v1443_v45, %s2381_s5 }
 0x32f   :  { %1732 = vrot.lane.b32.xlu0 %v1483_v54, %s2376_s11 }
 0x331   :  { %v1625_v33 = vpop.permute.xlu0 %1624  ;;  %v1663_v56 = vpop.permute.xlu2 %1662 }
 0x332   :  { %v1779_v53 = vsel %vm1777_vm4, %v1770_v9, %v1625_v33  ;;  %v1531_v31 = vpop.permute.xlu1 %1530 }
 0x333   :  { %v1788_v1 = vsel %vm1786_vm5, %v1779_v53, %v1657_v21  ;;  %v1746_v21 = vsel %vm56_vm0, %v3434_v18, %v3567_v46  ;;  %v1747_v18 = vsel %vm56_vm0, %v3446_v37, %v3574_v35  ;;  %v1744_v37 = vsel %vm56_vm0, %v3412_v8, %v3576_v43 }
 0x334   :  { %v1749_v35 = vsel %vm56_vm0, %v3467_v60, %v3606_v26 }
 0x336   :  { %1728 = vrot.lane.b32.xlu1 %v1478_v11, %s2376_s11 }
 0x339   :  { %v1659_v28 = vpop.permute.xlu0 %1658  ;;  %v1539_v30 = vpop.permute.xlu2 %1538 }
 0x33a   :  { %v1627_v34 = vpop.permute.xlu1 %1626  ;;  %v1757_v41 = vsel %vm1750_vm1, %v1748_v58, %v1539_v30 }
 0x33b   :  { %v1766_v6 = vsel %vm1759_vm2, %v1757_v41, %v3561_v16 }
 0x33c   :  { %v1775_v48 = vsel %vm1768_vm3, %v1766_v6, %v1603_v62 }
 0x33d   :  { %v3646_v4 = vsel %vm1777_vm4, %v1775_v48, %v3584_v59 }
 0x341   :  { %v1535_v11 = vpop.permute.xlu0 %1534 }
 0x342   :  { %v1661_v57 = vpop.permute.xlu1 %1660  ;;  %v1755_v27 = vsel %vm1750_vm1, %v1746_v21, %v1535_v11 }
 0x343   :  { %v1764_v55 = vsel %vm1759_vm2, %v1755_v27, %v3541_v50 }
 0x344   :  { %v1773_v16 = vsel %vm1768_vm3, %v1764_v55, %v3592_v39 }
 0x345   :  { %v1782_v62 = vsel %vm1777_vm4, %v1773_v16, %v3588_v12 }
 0x346   :  { %v1791_v59 = vsel %vm1786_vm5, %v1782_v62, %v1663_v56 }
 0x348   :  { %v1669_v0 = vpop.permute.xlu2 %1668 }
 0x34a   :  { %v1537_v46 = vpop.permute.xlu1 %1536 }
 0x34b   :  { %v1756_v3 = vsel %vm1750_vm1, %v1747_v18, %v1537_v46 }
 0x34c   :  { %v1765_v10 = vsel %vm1759_vm2, %v1756_v3, %v3551_v17  ;;  %v1753_v17 = vsel %vm1750_vm1, %v1744_v37, %v1531_v31 }
 0x34d   :  { %v1774_v50 = vsel %vm1768_vm3, %v1765_v10, %v3580_v22  ;;  %v1762_v22 = vsel %vm1759_vm2, %v1753_v17, %v3543_v7 }
 0x34e   :  { %v1783_v39 = vsel %vm1777_vm4, %v1774_v50, %v3599_v38  ;;  %v1771_v5 = vsel %vm1768_vm3, %v1762_v22, %v3559_v51 }
 0x34f   :  { %v1780_v43 = vsel %vm1777_vm4, %v1771_v5, %v1627_v34 }
 0x350   :  { %v1665_v12 = vpop.permute.xlu0 %1664  ;;  %v1789_v26 = vsel %vm1786_vm5, %v1780_v43, %v1659_v28 }
 0x351   :  { %v1719_v19 = vpop.permute.xlu2 %1718  ;;  %v1792_v54 = vsel %vm1786_vm5, %v1783_v39, %v1665_v12 }
 0x352   :  { %v1804_v20 = vsel %vm56_vm0, %v3519_v14, %v1719_v19 }
 0x353   :  { %1813 = vst.msk [vmem:[%s3787_s8 + $0x8] sm:$0xff] %vm1750_vm1, %v1804_v20 }
 0x358   :  { %v1667_v51 = vpop.permute.xlu1 %1666 }
 0x359   :  { %v1541_v38 = vpop.permute.xlu0 %1540  ;;  %v1793_v41 = vsel %vm1786_vm5, %v3646_v4, %v1667_v51 }
 0x35a   :  { %v1758_v14 = vsel %vm1750_vm1, %v1749_v35, %v1541_v38 }
 0x35b   :  { %v1767_v47 = vsel %vm1759_vm2, %v1758_v14, %v3549_v29  ;;  %v1787_v29 = vsel %vm1786_vm5, %v3602_v42, %v3623_v2 }
 0x35c   :  { %v1776_v8 = vsel %vm1768_vm3, %v1767_v47, %v3613_v61 }
 0x35d   :  { %v1785_v60 = vsel %vm1777_vm4, %v1776_v8, %v3609_v15 }
 0x35e   :  { %v1794_v7 = vsel %vm1786_vm5, %v1785_v60, %v1669_v0 }
 0x360   :  { %v1691_v52 = vpop.permute.xlu2 %1690 }
 0x361   :  { %v1798_v40 = vsel %vm1795_vm6, %v1789_v26, %v1691_v52 }
 0x362   :  { %1816 = vst [vmem:[%s3787_s8 + $0x20] sm:$0xff] %v1798_v40 }
 0x368   :  { %v1687_v61 = vpop.permute.xlu0 %1686 }
 0x369   :  { %v1725_v13 = vpop.permute.xlu2 %1724  ;;  %v1796_v15 = vsel %vm1795_vm6, %v1787_v29, %v1687_v61 }
 0x36a   :  { %v1807_v9 = vsel %vm56_vm0, %v3536_v36, %v1725_v13  ;;  %1812 = vst [vmem:[%s3787_s8] sm:$0xff] %v1796_v15 }
 0x36b   :  { %1819 = vst.msk [vmem:[%s3787_s8 + $0x38] sm:$0xff] %vm1750_vm1, %v1807_v9 }
 0x370   :  { %v1689_v45 = vpop.permute.xlu1 %1688 }
 0x371   :  { %v1797_v42 = vsel %vm1795_vm6, %v1788_v1, %v1689_v45  ;;  %v1721_v2 = vpop.permute.xlu0 %1720 }
 0x372   :  { %1814 = vst [vmem:[%s3787_s8 + $0x10] sm:$0xff] %v1797_v42  ;;  %v1805_v36 = vsel %vm56_vm0, %v3524_v32, %v1721_v2  ;;  %v1790_v32 = vsel %vm1786_vm5, %v3629_v44, %v1661_v57 }
 0x373   :  { %1815 = vst.msk [vmem:[%s3787_s8 + $0x18] sm:$0xff] %vm1750_vm1, %v1805_v36 }
 0x378   :  { %v1697_v33 = vpop.permute.xlu2 %1696 }
 0x379   :  { %v1723_v53 = vpop.permute.xlu1 %1722  ;;  %v1801_v31 = vsel %vm1795_vm6, %v1792_v54, %v1697_v33 }
 0x37a   :  { %v1806_v56 = vsel %vm56_vm0, %v3529_v25, %v1723_v53  ;;  %1822 = vst [vmem:[%s3787_s8 + $0x50] sm:$0xff] %v1801_v31 }
 0x37b   :  { %1817 = vst.msk [vmem:[%s3787_s8 + $0x28] sm:$0xff] %vm1750_vm1, %v1806_v56 }
 0x380   :  { %v1693_v1 = vpop.permute.xlu0 %1692 }
 0x381   :  { %v1731_v28 = vpop.permute.xlu2 %1730  ;;  %v1799_v58 = vsel %vm1795_vm6, %v1790_v32, %v1693_v1 }
 0x382   :  { %v1810_v34 = vsel %vm56_vm0, %v3563_v63, %v1731_v28  ;;  %1818 = vst [vmem:[%s3787_s8 + $0x30] sm:$0xff] %v1799_v58 }
 0x383   :  { %1825 = vst.msk [vmem:[%s3787_s8 + $0x68] sm:$0xff] %vm1750_vm1, %v1810_v34 }
 0x388   :  { %v1695_v25 = vpop.permute.xlu1 %1694 }
 0x389   :  { %v1800_v30 = vsel %vm1795_vm6, %v1791_v59, %v1695_v25  ;;  %v1727_v44 = vpop.permute.xlu0 %1726 }
 0x38a   :  { %1820 = vst [vmem:[%s3787_s8 + $0x40] sm:$0xff] %v1800_v30  ;;  %v1808_v63 = vsel %vm56_vm0, %v3545_v49, %v1727_v44 }
 0x38b   :  { %1821 = vst.msk [vmem:[%s3787_s8 + $0x48] sm:$0xff] %vm1750_vm1, %v1808_v63 }
 0x398   :  { %v1699_v6 = vpop.permute.xlu0 %1698 }
 0x399   :  { %v1802_v48 = vsel %vm1795_vm6, %v1793_v41, %v1699_v6 }
 0x39a   :  { %1824 = vst [vmem:[%s3787_s8 + $0x60] sm:$0xff] %v1802_v48 }
 0x3a0   :  { %v1701_v21 = vpop.permute.xlu1 %1700 }
 0x3a1   :  { %v1803_v11 = vsel %vm1795_vm6, %v1794_v7, %v1701_v21  ;;  %v1733_v57 = vpop.permute.xlu0 %1732 }
 0x3a2   :  { %1826 = vst [vmem:[%s3787_s8 + $0x70] sm:$0xff] %v1803_v11  ;;  %v1811_v49 = vsel %vm56_vm0, %v3571_v23, %v1733_v57 }
 0x3a3   :  { %1827 = vst.msk [vmem:[%s3787_s8 + $0x78] sm:$0xff] %vm1750_vm1, %v1811_v49 }
 0x3a8   :  { %v1729_v4 = vpop.permute.xlu1 %1728 }
 0x3a9   :  { %v1809_v27 = vsel %vm56_vm0, %v3555_v24, %v1729_v4 }
 0x3aa   :  { %1823 = vst.msk [vmem:[%s3787_s8 + $0x58] sm:$0xff] %vm1750_vm1, %v1809_v27 }

</bundles_post_ra>
